<compile_context>
chip_gen: v7x
topology: tpu7x:2x2x1
jax: 0.10.0
libtpu: 0.0.40
codegen_flags: <defaults>
</compile_context>

<pallas_src>
import functools

import jax
import jax.numpy as jnp
from jax import lax
from jax.experimental import pallas as pl
from jax.experimental.pallas import tpu as pltpu

C1 = 32   # conv1 out channels
C2 = 32   # conv2 out channels
K1 = 32   # lanes of the conv1 patch slab (4 taps + bias flag + zero padding)


def _pick_batch_block(n):
    """Largest batch tile that keeps >=2 grid steps (for 2-core chips)."""
    for cand in (8, 4, 2, 1):
        if n % cand == 0 and n // cand >= 2:
            return cand
    return 1


def _geom(H, W):
    H2, W2 = H + 2, W + 2          # conv2 output spatial size
    Hp, Wp = H2 // 2, W2 // 2      # pooled spatial size
    RS = W + 4                     # flat row stride (even, >= W2 + 1)
    PO = (Hp + 1) * RS             # start of the odd-row region
    M2 = Hp * RS                   # matmul M per output-row parity
    P_rows = ((PO + M2 + 1 + 7) // 8) * 8
    return H2, W2, Hp, Wp, RS, PO, M2, P_rows


def _posenet_kernel(H, W, B_blk, pm_ref, w1_ref, w2_ref, b2_ref,
                    o_ref, p_ref, ye_ref, yo_ref):
    """Per-grid-step kernel over a block of B_blk images.

    pm_ref: (B_blk, P_rows, K1) conv1 im2col patches, pre-laid-out in the flat
                                 padded even/odd layout (zeros on pad rows)
    w1_ref: (K1, C1)             conv1 taps (rows 0..3) + bias (row 4)
    w2_ref: (2, 2, C1, C2)       conv2 taps [kh, kw, cin, cout]
    b2_ref: (1, C2)
    o_ref : (B_blk, Mp, C2)      pooled output incl. one junk pooled column
    p_ref : VMEM (P_rows, C1)    flat, zero-padded conv1 output:
                                   rows [0, (Hp+1)*RS)  = even h1p rows
                                   rows [PO, PO+Hp*RS)  = odd  h1p rows
                                 (each h1p row occupies RS slots; cols 1..W1
                                  meaningful, borders zero)
    ye_ref / yo_ref: VMEM (M2, C2)  conv2+ReLU for even / odd output rows
    """
    H2 = H + 2
    Hp = H2 // 2
    RS = W + 4
    PO = (Hp + 1) * RS
    M2 = Hp * RS
    Mp = M2 // 2

    w1 = w1_ref[...]               # (K1, C1)
    b2 = b2_ref[0]                 # (C2,)
    w2_00 = w2_ref[0, 0]
    w2_01 = w2_ref[0, 1]
    w2_10 = w2_ref[1, 0]
    w2_11 = w2_ref[1, 1]

    for b in range(B_blk):
        # ---- conv1 + bias + ReLU: one MXU matmul fills the whole padded,
        #      even/odd-split conv1 map.  Pad/junk rows have all-zero patch
        #      rows, so relu(0 @ w) keeps the required zero borders. ---------
        p_ref[...] = jnp.maximum(
            jnp.dot(pm_ref[b], w1, preferred_element_type=jnp.float32), 0.0)

        # ---- conv2 + bias + ReLU as shifted big-M matmuls ------------------
        def tapdot(start, wmat):
            return jnp.dot(p_ref[pl.ds(start, M2), :], wmat,
                           preferred_element_type=jnp.float32)

        # even output rows h = 2i: taps (0,kw) read even h1p rows, (1,kw) odd
        y_even = (tapdot(0, w2_00) + tapdot(1, w2_01)
                  + tapdot(PO, w2_10) + tapdot(PO + 1, w2_11))
        ye_ref[...] = jnp.maximum(y_even + b2, 0.0)

        # odd output rows h = 2i+1: taps (0,kw) read odd h1p rows, (1,kw) the
        # next even h1p row (one RS-block further down in the even region)
        y_odd = (tapdot(PO, w2_00) + tapdot(PO + 1, w2_01)
                 + tapdot(RS, w2_10) + tapdot(RS + 1, w2_11))
        yo_ref[...] = jnp.maximum(y_odd + b2, 0.0)

        # ---- MaxPool2d(2,2): H-pool across the even/odd split, W-pool via
        #      stride-2 sublane loads; one store per image --------------------
        pooled = jnp.maximum(
            jnp.maximum(ye_ref[pl.ds(0, Mp, stride=2), :],
                        ye_ref[pl.ds(1, Mp, stride=2), :]),
            jnp.maximum(yo_ref[pl.ds(0, Mp, stride=2), :],
                        yo_ref[pl.ds(1, Mp, stride=2), :]))
        o_ref[b] = pooled                                        # (Mp, C2)


def posenet_forward(x_nchw, w1_oihw, b1, w2_oihw, b2):
    """Forward pass matching PyTorch PoseNet. x_nchw: (N, 1, H, W) float32."""
    N, Cin, H, W = x_nchw.shape
    assert Cin == 1 and H % 2 == 0 and W % 2 == 0
    H2, W2, Hp, Wp, RS, PO, M2, P_rows = _geom(H, W)
    H1, W1 = H + 1, W + 1
    Mp = M2 // 2
    Wq = RS // 2                      # padded pooled width (>= Wp)

    B_blk = _pick_batch_block(N)
    grid = (N // B_blk,)

    # ---- wrapper-side layout plumbing (plain JAX, no kernel compute) -------
    # conv1 im2col patch slab laid out exactly like the kernel's flat padded
    # conv1 output: even h1p rows first (Hp+1 blocks), then odd h1p rows
    # (Hp blocks), row stride RS, data at columns 1..W1 of each block.
    xp = jnp.pad(x_nchw[:, 0], ((0, 0), (1, 1), (1, 1)))           # (N,H2,W2)
    taps = jnp.stack([xp[:, kh:kh + H1, kw:kw + W1]
                      for kh in (0, 1) for kw in (0, 1)], axis=-1)  # (N,H1,W1,4)
    ones = jnp.ones((N, H1, W1, 1), x_nchw.dtype)
    pk = jnp.concatenate([taps, ones], axis=-1)                     # (N,H1,W1,5)
    pk = jnp.pad(pk, ((0, 0), (0, 0), (0, 0), (0, K1 - 5)))         # (N,H1,W1,K1)

    def to_flat(rows):               # (N, nb, W1, K1) -> (N, nb*RS, K1)
        rows = jnp.pad(rows, ((0, 0), (0, 0), (1, RS - 1 - W1), (0, 0)))
        return rows.reshape(N, -1, K1)

    odd_region = to_flat(pk[:, 0::2])     # conv1 rows 0,2,... -> h1p odd rows
    even_inner = to_flat(pk[:, 1::2])     # conv1 rows 1,3,... -> h1p even rows
    even_region = jnp.pad(even_inner, ((0, 0), (RS, RS), (0, 0)))   # pad rows 0, 2Hp
    pm = jnp.concatenate([even_region, odd_region], axis=1)        # (N,PO+M2,K1)
    pm = jnp.pad(pm, ((0, 0), (0, P_rows - (PO + M2)), (0, 0)))    # (N,P_rows,K1)

    # conv1 weights augmented with the bias row (matches lane 4 of the slab).
    w1_k = jnp.transpose(w1_oihw, (2, 3, 1, 0)).reshape(4, C1)      # (4,C1)
    w1_aug = jnp.concatenate(
        [w1_k, b1.reshape(1, C1), jnp.zeros((K1 - 5, C1), w1_k.dtype)], axis=0)
    w2_k = jnp.transpose(w2_oihw, (2, 3, 1, 0))                     # (2,2,C1,C2)
    b2_k = b2.reshape(1, C2)

    kernel = functools.partial(_posenet_kernel, H, W, B_blk)

    out = pl.pallas_call(
        kernel,
        out_shape=jax.ShapeDtypeStruct((N, Mp, C2), jnp.float32),
        grid_spec=pltpu.PrefetchScalarGridSpec(
            num_scalar_prefetch=0,
            grid=grid,
            in_specs=[
                pl.BlockSpec((B_blk, P_rows, K1), lambda g: (g, 0, 0)),
                pl.BlockSpec((K1, C1), lambda g: (0, 0)),
                pl.BlockSpec((2, 2, C1, C2), lambda g: (0, 0, 0, 0)),
                pl.BlockSpec((1, C2), lambda g: (0, 0)),
            ],
            out_specs=pl.BlockSpec((B_blk, Mp, C2), lambda g: (g, 0, 0)),
            scratch_shapes=[
                pltpu.VMEM((P_rows, C1), jnp.float32),   # flat padded conv1 out
                pltpu.VMEM((M2, C2), jnp.float32),       # conv2, even rows
                pltpu.VMEM((M2, C2), jnp.float32),       # conv2, odd rows
            ],
        ),
        compiler_params=pltpu.CompilerParams(
            dimension_semantics=("parallel",)),
    )(pm, w1_aug, w2_k, b2_k)

    # Drop the junk pooled column, then flatten in PyTorch NCHW order.
    out = out.reshape(N, Hp, Wq, C2)[:, :, :Wp, :]                  # (N,Hp,Wp,C2)
    return jnp.transpose(out, (0, 3, 1, 2)).reshape(N, C2 * Hp * Wp)


def posenet_reference(x, w1, b1, w2, b2):
    """Pure-JAX reference (XLA convs), NCHW, matches PyTorch semantics."""
    dn = ("NCHW", "OIHW", "NCHW")
    y = lax.conv_general_dilated(x, w1, (1, 1), ((1, 1), (1, 1)),
                                 dimension_numbers=dn)
    y = jax.nn.relu(y + b1[None, :, None, None])
    y = lax.conv_general_dilated(y, w2, (1, 1), ((1, 1), (1, 1)),
                                 dimension_numbers=dn)
    y = jax.nn.relu(y + b2[None, :, None, None])
    y = lax.reduce_window(y, -jnp.inf, lax.max,
                          (1, 1, 2, 2), (1, 1, 2, 2), "VALID")
    return y.reshape(y.shape[0], -1)


if __name__ == "__main__":
    key = jax.random.PRNGKey(0)
    kx, k1, kb1, k2, kb2 = jax.random.split(key, 5)

    N, H, W = 2, 16, 16
    x = jax.random.normal(kx, (N, 1, H, W), jnp.float32)
    # Deterministic synthetic parameters (shapes from PyTorch Conv2d defaults).
    w1 = 0.5 * jax.random.normal(k1, (C1, 1, 2, 2), jnp.float32)    # OIHW
    b1 = 0.1 * jax.random.normal(kb1, (C1,), jnp.float32)
    w2 = 0.1 * jax.random.normal(k2, (C2, C1, 2, 2), jnp.float32)   # OIHW
    b2 = 0.1 * jax.random.normal(kb2, (C2,), jnp.float32)

    y_kernel = posenet_forward(x, w1, b1, w2, b2)
    jax.block_until_ready(y_kernel)

    y_ref = posenet_reference(x, w1, b1, w2, b2)
    assert y_kernel.shape == (N, C2 * ((H + 2) // 2) * ((W + 2) // 2))
    assert bool(jnp.allclose(y_kernel, y_ref, rtol=2e-2, atol=2e-2)), (
        float(jnp.max(jnp.abs(y_kernel - y_ref))))
    print("KERNEL_OK")
</pallas_src>

<mosaic_0001>
module attributes {stable_mosaic.version = 11 : i64} {
  func.func @_posenet_kernel(%arg0: i32, %arg1: memref<1x384x32xf32, #tpu.memory_space<vmem>>, %arg2: memref<32x32xf32, #tpu.memory_space<vmem>>, %arg3: memref<2x2x32x32xf32, #tpu.memory_space<vmem>>, %arg4: memref<1x32xf32, #tpu.memory_space<vmem>>, %arg5: memref<1x90x32xf32, #tpu.memory_space<vmem>>, %arg6: memref<384x32xf32, #tpu.memory_space<vmem>>, %arg7: memref<180x32xf32, #tpu.memory_space<vmem>>, %arg8: memref<180x32xf32, #tpu.memory_space<vmem>>) attributes {dimension_semantics = [#tpu.dimension_semantics<parallel>], iteration_bounds = array<i64: 2>, scalar_prefetch = 0 : i64, scratch_operands = 3 : i64, tpu.core_type = #tpu.core_type<tc>, window_params = [{transform_indices = @transform_0, window_bounds = array<i64: 1, 384, 32>}, {pipeline_mode = #tpu.pipeline_mode<synchronous>, transform_indices = @transform_1, window_bounds = array<i64: 32, 32>}, {pipeline_mode = #tpu.pipeline_mode<synchronous>, transform_indices = @transform_2, window_bounds = array<i64: 2, 2, 32, 32>}, {pipeline_mode = #tpu.pipeline_mode<synchronous>, transform_indices = @transform_3, window_bounds = array<i64: 1, 32>}, {transform_indices = @transform_4, window_bounds = array<i64: 1, 90, 32>}]} {
    %c0 = arith.constant 0 : index
    %c0_0 = arith.constant 0 : index
    %0 = vector.load %arg2[%c0, %c0_0] : memref<32x32xf32, #tpu.memory_space<vmem>>, vector<32x32xf32>
    %c0_1 = arith.constant 0 : index
    %c0_2 = arith.constant 0 : index
    %1 = vector.load %arg4[%c0_1, %c0_2] : memref<1x32xf32, #tpu.memory_space<vmem>>, vector<1x32xf32>
    %2 = vector.shape_cast %1 : vector<1x32xf32> to vector<32xf32>
    %c0_3 = arith.constant 0 : index
    %c0_4 = arith.constant 0 : index
    %c0_5 = arith.constant 0 : index
    %c0_6 = arith.constant 0 : index
    %3 = vector.load %arg3[%c0_3, %c0_4, %c0_5, %c0_6] : memref<2x2x32x32xf32, #tpu.memory_space<vmem>>, vector<1x1x32x32xf32>
    %4 = vector.shape_cast %3 : vector<1x1x32x32xf32> to vector<32x32xf32>
    %c0_7 = arith.constant 0 : index
    %c1 = arith.constant 1 : index
    %c0_8 = arith.constant 0 : index
    %c0_9 = arith.constant 0 : index
    %5 = vector.load %arg3[%c0_7, %c1, %c0_8, %c0_9] : memref<2x2x32x32xf32, #tpu.memory_space<vmem>>, vector<1x1x32x32xf32>
    %6 = vector.shape_cast %5 : vector<1x1x32x32xf32> to vector<32x32xf32>
    %c1_10 = arith.constant 1 : index
    %c0_11 = arith.constant 0 : index
    %c0_12 = arith.constant 0 : index
    %c0_13 = arith.constant 0 : index
    %7 = vector.load %arg3[%c1_10, %c0_11, %c0_12, %c0_13] : memref<2x2x32x32xf32, #tpu.memory_space<vmem>>, vector<1x1x32x32xf32>
    %8 = vector.shape_cast %7 : vector<1x1x32x32xf32> to vector<32x32xf32>
    %c1_14 = arith.constant 1 : index
    %c1_15 = arith.constant 1 : index
    %c0_16 = arith.constant 0 : index
    %c0_17 = arith.constant 0 : index
    %9 = vector.load %arg3[%c1_14, %c1_15, %c0_16, %c0_17] : memref<2x2x32x32xf32, #tpu.memory_space<vmem>>, vector<1x1x32x32xf32>
    %10 = vector.shape_cast %9 : vector<1x1x32x32xf32> to vector<32x32xf32>
    %c0_18 = arith.constant 0 : index
    %c0_19 = arith.constant 0 : index
    %c0_20 = arith.constant 0 : index
    %11 = vector.load %arg1[%c0_18, %c0_19, %c0_20] : memref<1x384x32xf32, #tpu.memory_space<vmem>>, vector<1x384x32xf32>
    %12 = vector.shape_cast %11 : vector<1x384x32xf32> to vector<384x32xf32>
    %cst = arith.constant dense<0.000000e+00> : vector<384x32xf32>
    %13 = tpu.matmul %12, %0, %cst {dimension_numbers = #tpu.dot_dimension_numbers<[1], [0], [0], [1], [0, 0, 1, 1], [], []>} : vector<384x32xf32>, vector<32x32xf32>, vector<384x32xf32> -> vector<384x32xf32>
    %cst_21 = arith.constant 0.000000e+00 : f32
    %14 = vector.broadcast %cst_21 : f32 to vector<384x32xf32>
    %15 = arith.maximumf %13, %14 : vector<384x32xf32>
    %c0_22 = arith.constant 0 : index
    %c0_23 = arith.constant 0 : index
    %16 = vector.load %arg6[%c0_22, %c0_23] : memref<384x32xf32, #tpu.memory_space<vmem>>, vector<384x32xf32>
    tpu.vector_store %arg6[%c0_22, %c0_23], %15 {strides = array<i32>} : memref<384x32xf32, #tpu.memory_space<vmem>>, vector<384x32xf32>,
    %c0_24 = arith.constant 0 : index
    %c0_25 = arith.constant 0 : index
    %17 = vector.load %arg6[%c0_24, %c0_25] : memref<384x32xf32, #tpu.memory_space<vmem>>, vector<180x32xf32>
    %cst_26 = arith.constant dense<0.000000e+00> : vector<180x32xf32>
    %18 = tpu.matmul %17, %4, %cst_26 {dimension_numbers = #tpu.dot_dimension_numbers<[1], [0], [0], [1], [0, 0, 1, 1], [], []>} : vector<180x32xf32>, vector<32x32xf32>, vector<180x32xf32> -> vector<180x32xf32>
    %c1_27 = arith.constant 1 : index
    %c0_28 = arith.constant 0 : index
    %19 = vector.load %arg6[%c1_27, %c0_28] : memref<384x32xf32, #tpu.memory_space<vmem>>, vector<180x32xf32>
    %cst_29 = arith.constant dense<0.000000e+00> : vector<180x32xf32>
    %20 = tpu.matmul %19, %6, %cst_29 {dimension_numbers = #tpu.dot_dimension_numbers<[1], [0], [0], [1], [0, 0, 1, 1], [], []>} : vector<180x32xf32>, vector<32x32xf32>, vector<180x32xf32> -> vector<180x32xf32>
    %21 = arith.addf %18, %20 : vector<180x32xf32>
    %c200 = arith.constant 200 : index
    %c0_30 = arith.constant 0 : index
    %22 = vector.load %arg6[%c200, %c0_30] : memref<384x32xf32, #tpu.memory_space<vmem>>, vector<180x32xf32>
    %cst_31 = arith.constant dense<0.000000e+00> : vector<180x32xf32>
    %23 = tpu.matmul %22, %8, %cst_31 {dimension_numbers = #tpu.dot_dimension_numbers<[1], [0], [0], [1], [0, 0, 1, 1], [], []>} : vector<180x32xf32>, vector<32x32xf32>, vector<180x32xf32> -> vector<180x32xf32>
    %24 = arith.addf %21, %23 : vector<180x32xf32>
    %c201 = arith.constant 201 : index
    %c0_32 = arith.constant 0 : index
    %25 = vector.load %arg6[%c201, %c0_32] : memref<384x32xf32, #tpu.memory_space<vmem>>, vector<180x32xf32>
    %cst_33 = arith.constant dense<0.000000e+00> : vector<180x32xf32>
    %26 = tpu.matmul %25, %10, %cst_33 {dimension_numbers = #tpu.dot_dimension_numbers<[1], [0], [0], [1], [0, 0, 1, 1], [], []>} : vector<180x32xf32>, vector<32x32xf32>, vector<180x32xf32> -> vector<180x32xf32>
    %27 = arith.addf %24, %26 : vector<180x32xf32>
    %28 = vector.shape_cast %2 : vector<32xf32> to vector<1x32xf32>
    %29 = vector.broadcast %28 : vector<1x32xf32> to vector<180x32xf32>
    %30 = arith.addf %27, %29 : vector<180x32xf32>
    %cst_34 = arith.constant 0.000000e+00 : f32
    %31 = vector.broadcast %cst_34 : f32 to vector<180x32xf32>
    %32 = arith.maximumf %30, %31 : vector<180x32xf32>
    %c0_35 = arith.constant 0 : index
    %c0_36 = arith.constant 0 : index
    %33 = vector.load %arg7[%c0_35, %c0_36] : memref<180x32xf32, #tpu.memory_space<vmem>>, vector<180x32xf32>
    tpu.vector_store %arg7[%c0_35, %c0_36], %32 {strides = array<i32>} : memref<180x32xf32, #tpu.memory_space<vmem>>, vector<180x32xf32>,
    %c200_37 = arith.constant 200 : index
    %c0_38 = arith.constant 0 : index
    %34 = vector.load %arg6[%c200_37, %c0_38] : memref<384x32xf32, #tpu.memory_space<vmem>>, vector<180x32xf32>
    %cst_39 = arith.constant dense<0.000000e+00> : vector<180x32xf32>
    %35 = tpu.matmul %34, %4, %cst_39 {dimension_numbers = #tpu.dot_dimension_numbers<[1], [0], [0], [1], [0, 0, 1, 1], [], []>} : vector<180x32xf32>, vector<32x32xf32>, vector<180x32xf32> -> vector<180x32xf32>
    %c201_40 = arith.constant 201 : index
    %c0_41 = arith.constant 0 : index
    %36 = vector.load %arg6[%c201_40, %c0_41] : memref<384x32xf32, #tpu.memory_space<vmem>>, vector<180x32xf32>
    %cst_42 = arith.constant dense<0.000000e+00> : vector<180x32xf32>
    %37 = tpu.matmul %36, %6, %cst_42 {dimension_numbers = #tpu.dot_dimension_numbers<[1], [0], [0], [1], [0, 0, 1, 1], [], []>} : vector<180x32xf32>, vector<32x32xf32>, vector<180x32xf32> -> vector<180x32xf32>
    %38 = arith.addf %35, %37 : vector<180x32xf32>
    %c20 = arith.constant 20 : index
    %c0_43 = arith.constant 0 : index
    %39 = vector.load %arg6[%c20, %c0_43] : memref<384x32xf32, #tpu.memory_space<vmem>>, vector<180x32xf32>
    %cst_44 = arith.constant dense<0.000000e+00> : vector<180x32xf32>
    %40 = tpu.matmul %39, %8, %cst_44 {dimension_numbers = #tpu.dot_dimension_numbers<[1], [0], [0], [1], [0, 0, 1, 1], [], []>} : vector<180x32xf32>, vector<32x32xf32>, vector<180x32xf32> -> vector<180x32xf32>
    %41 = arith.addf %38, %40 : vector<180x32xf32>
    %c21 = arith.constant 21 : index
    %c0_45 = arith.constant 0 : index
    %42 = vector.load %arg6[%c21, %c0_45] : memref<384x32xf32, #tpu.memory_space<vmem>>, vector<180x32xf32>
    %cst_46 = arith.constant dense<0.000000e+00> : vector<180x32xf32>
    %43 = tpu.matmul %42, %10, %cst_46 {dimension_numbers = #tpu.dot_dimension_numbers<[1], [0], [0], [1], [0, 0, 1, 1], [], []>} : vector<180x32xf32>, vector<32x32xf32>, vector<180x32xf32> -> vector<180x32xf32>
    %44 = arith.addf %41, %43 : vector<180x32xf32>
    %45 = vector.shape_cast %2 : vector<32xf32> to vector<1x32xf32>
    %46 = vector.broadcast %45 : vector<1x32xf32> to vector<180x32xf32>
    %47 = arith.addf %44, %46 : vector<180x32xf32>
    %cst_47 = arith.constant 0.000000e+00 : f32
    %48 = vector.broadcast %cst_47 : f32 to vector<180x32xf32>
    %49 = arith.maximumf %47, %48 : vector<180x32xf32>
    %c0_48 = arith.constant 0 : index
    %c0_49 = arith.constant 0 : index
    %50 = vector.load %arg8[%c0_48, %c0_49] : memref<180x32xf32, #tpu.memory_space<vmem>>, vector<180x32xf32>
    tpu.vector_store %arg8[%c0_48, %c0_49], %49 {strides = array<i32>} : memref<180x32xf32, #tpu.memory_space<vmem>>, vector<180x32xf32>,
    %c0_50 = arith.constant 0 : index
    %c0_51 = arith.constant 0 : index
    %51 = tpu.strided_load %arg7[%c0_50, %c0_51] {strides = array<i32: 2, 1>} : memref<180x32xf32, #tpu.memory_space<vmem>>, vector<90x32xf32>
    %c1_52 = arith.constant 1 : index
    %c0_53 = arith.constant 0 : index
    %52 = tpu.strided_load %arg7[%c1_52, %c0_53] {strides = array<i32: 2, 1>} : memref<180x32xf32, #tpu.memory_space<vmem>>, vector<90x32xf32>
    %53 = arith.maximumf %51, %52 : vector<90x32xf32>
    %c0_54 = arith.constant 0 : index
    %c0_55 = arith.constant 0 : index
    %54 = tpu.strided_load %arg8[%c0_54, %c0_55] {strides = array<i32: 2, 1>} : memref<180x32xf32, #tpu.memory_space<vmem>>, vector<90x32xf32>
    %c1_56 = arith.constant 1 : index
    %c0_57 = arith.constant 0 : index
    %55 = tpu.strided_load %arg8[%c1_56, %c0_57] {strides = array<i32: 2, 1>} : memref<180x32xf32, #tpu.memory_space<vmem>>, vector<90x32xf32>
    %56 = arith.maximumf %54, %55 : vector<90x32xf32>
    %57 = arith.maximumf %53, %56 : vector<90x32xf32>
    %c0_58 = arith.constant 0 : index
    %c0_59 = arith.constant 0 : index
    %c0_60 = arith.constant 0 : index
    %58 = vector.load %arg5[%c0_58, %c0_59, %c0_60] : memref<1x90x32xf32, #tpu.memory_space<vmem>>, vector<1x90x32xf32>
    %59 = vector.shape_cast %58 : vector<1x90x32xf32> to vector<90x32xf32>
    %60 = vector.shape_cast %57 : vector<90x32xf32> to vector<1x90x32xf32>
    tpu.vector_store %arg5[%c0_58, %c0_59, %c0_60], %60 {strides = array<i32>} : memref<1x90x32xf32, #tpu.memory_space<vmem>>, vector<1x90x32xf32>,
    return
  }
  func.func @transform_0(%arg0: i32) -> (i32, i32, i32) {
    %c0_i32 = arith.constant 0 : i32
    %c0_i32_0 = arith.constant 0 : i32
    %c0_i32_1 = arith.constant 0 : i32
    return %arg0, %c0_i32, %c0_i32_0 : i32, i32, i32
  }
  func.func @transform_1(%arg0: i32) -> (i32, i32) {
    %c0_i32 = arith.constant 0 : i32
    %c0_i32_0 = arith.constant 0 : i32
    %c0_i32_1 = arith.constant 0 : i32
    return %c0_i32, %c0_i32_0 : i32, i32
  }
  func.func @transform_2(%arg0: i32) -> (i32, i32, i32, i32) {
    %c0_i32 = arith.constant 0 : i32
    %c0_i32_0 = arith.constant 0 : i32
    %c0_i32_1 = arith.constant 0 : i32
    %c0_i32_2 = arith.constant 0 : i32
    %c0_i32_3 = arith.constant 0 : i32
    return %c0_i32, %c0_i32_0, %c0_i32_1, %c0_i32_2 : i32, i32, i32, i32
  }
  func.func @transform_3(%arg0: i32) -> (i32, i32) {
    %c0_i32 = arith.constant 0 : i32
    %c0_i32_0 = arith.constant 0 : i32
    %c0_i32_1 = arith.constant 0 : i32
    return %c0_i32, %c0_i32_0 : i32, i32
  }
  func.func @transform_4(%arg0: i32) -> (i32, i32, i32) {
    %c0_i32 = arith.constant 0 : i32
    %c0_i32_0 = arith.constant 0 : i32
    %c0_i32_1 = arith.constant 0 : i32
    return %arg0, %c0_i32, %c0_i32_0 : i32, i32, i32
  }
}

</mosaic_0001>

<bundles_post_ra>
// kernel: tpu_custom_call.1
= control target key start
LH: loop header
LB: loop body
LE: loop exit
PB: predicated region body
PF: predicated region fallthrough
CT: control target
= control target key end

     0   :  { %s4755_s15 = smov 0   ;;  %s6107_s0 = inlined_call_operand.vmem [shape: f32[2,384,32], index: 0, kind: input, shape index: {}]   ;;  %s6108_s1 = inlined_call_operand.vmem [shape: f32[32,32], index: 1, kind: input, shape index: {}]   ;;  %s6109_s2 = inlined_call_operand.vmem [shape: f32[2,2,32,32], index: 2, kind: input, shape index: {}]   ;;  %s6110_s3 = inlined_call_operand.vmem [shape: f32[1,32], index: 3, kind: input, shape index: {}]   ;;  %s6111_s4 = inlined_call_operand.vmem [shape: f32[2,90,32], index: 4, kind: output, shape index: {}]  }
   0x1 LB: > { %s3427_s16 = sadd.s32 4294967295, %s4725_s15   ;;  %p3431_p0 = scmp.ge.s32.totalorder %s4725_s15, 1  ;;  %s4725_s15 = sphi %s4755_s15, %s14_s15  }
   0x2   : > { %p162_p1 = scmp.lt.s32.totalorder %s4725_s15, 3 }
   0x4   : > { %p163_p2 = pnand %p3431_p0, %p162_p1 }
   0x5   : > { %v198_v0 = vld [vmem:[%s6108_s1] sm:$0xff] (!%p163_p2)  ;;  %v199_v1 = vld [vmem:[%s6108_s1 + $0x8] sm:$0xff] (!%p163_p2)  ;;  %v200_v2 = vld [vmem:[%s6108_s1 + $0x10] sm:$0xff] (!%p163_p2)  ;;  %p188_p3 = scmp.lt.s32.totalorder (!%p163_p2), %s3427_s16, 1  ;;  %vm270_vm0 = vcmask (!%p163_p2), 261120   ;;  %v4727_v56 = vmov (!%p163_p2), 0.0|0.0  }
   0x6   : > { %166 = sbr.rel (%p163_p2) target bundleno = 910 (0x38e), region = 36  ;;  %v4645_v3 = vpack.c.bf16 (!%p163_p2), %v199_v1, %v198_v0  ;;  %v201_v4 = vld [vmem:[%s6108_s1 + $0x18] sm:$0xff] (!%p163_p2)  ;;  %v3434_v52 = vld [vmem:[%s6109_s2 + $0x20] sm:$0xff] (!%p163_p2)  ;;  %v3435_v53 = vld [vmem:[%s6109_s2 + $0x28] sm:$0xff] (!%p163_p2)  ;;  %4701 = vmatprep.subr.bf16.mxu1 (!%p163_p2), %v4727_v56  ;;  %vm4728_vm1 = vmmov (!%p163_p2), 0   ;;  %v4729_v61 = vmov (!%p163_p2), 0.0  }
   0x7   : > { %v4649_v5 = vpack.c.bf16 (!%p163_p2), %v201_v4, %v200_v2  ;;  %v4881_v55 = vpack.c.bf16 (!%p163_p2), %v3435_v53, %v3434_v52  ;;  %v3436_v58 = vld [vmem:[%s6109_s2 + $0x30] sm:$0xff] (!%p163_p2)  ;;  %v3437_v59 = vld [vmem:[%s6109_s2 + $0x38] sm:$0xff] (!%p163_p2)  ;;  %4070 = vmatprep.mubr.msk.f32.mxu1 (!%p163_p2), %vm4728_vm1, %v4729_v61  ;;  %vm2024_vm2 = vcmask (!%p163_p2), 257024   ;;  %vm3370_vm3 = vcmask (!%p163_p2), 254976  }
   0x8   : > { %4646 = vmatprep.subr.bf16.mxu0 (!%p163_p2), %v4645_v3  ;;  %v4897_v60 = vpack.c.bf16 (!%p163_p2), %v3437_v59, %v3436_v58  ;;  %v206_v52 = vld [vmem:[%s6109_s2 + $0x18] sm:$0xff] (!%p163_p2) }
   0x9   : > { %4648 = vmatpush3.bf16.msra.mxu0 (!%p163_p2), %v4645_v3  ;;  %4703 = vmatpush3.bf16.msra.mxu1 (!%p163_p2), %v4881_v55 }
   0xa   : > { %4650 = vmatprep.subr.bf16.mxu0 (!%p163_p2), %v4649_v5  ;;  %4702 = vmatprep.subr.bf16.mxu1 (!%p163_p2), %v4727_v56 }
   0xd   : > { %s6113_s16 = smov (!%p188_p3, %s3427_s16), 1  ;;  %4652 = vmatpush3.bf16.msra.mxu0 %v4649_v5  ;;  %4704 = vmatpush3.bf16.msra.mxu1 %v4897_v60 }
   0xe   : > { %s4705_s25 = smul.u32 384, %s6113_s16  ;;  %4653 = vmatprep.subr.bf16.mxu0 %v4727_v56  ;;  %4659 = vmatprep.subr.bf16.mxu1 %v4727_v56 }
   0xf   : > { %s4706_s13 = smul.u32 96, %s6113_s16 }
  0x10   : > { %s4781_s28 = scalar_lea.vmem %s6107_s0, %s4705_s25 }
  0x11   : > { %v222_v6 = vld [vmem:[%s4781_s28] sm:$0xff]  ;;  %v223_v7 = vld [vmem:[%s4781_s28 + $0x8] sm:$0xff]  ;;  %v224_v8 = vld [vmem:[%s4781_s28 + $0x10] sm:$0xff]  ;;  %s6028_s18 = scalar_lea.vmem %s6111_s4, %s4706_s13 }
  0x12   : > { %3957 = vmatprep.mubr.msk.f32.mxu0 %vm270_vm0, %v222_v6  ;;  %v225_v9 = vld [vmem:[%s4781_s28 + $0x18] sm:$0xff]  ;;  %v226_v10 = vld [vmem:[%s4781_s28 + $0x20] sm:$0xff]  ;;  %v227_v11 = vld [vmem:[%s4781_s28 + $0x28] sm:$0xff] }
  0x13   : > { %3958 = vmatmul.mubr.msk.f32.vlgmr.msra.gmra.mrb[0].mxu0 %vm270_vm0, %v223_v7  ;;  %v228_v12 = vld [vmem:[%s4781_s28 + $0x30] sm:$0xff]  ;;  %v229_v13 = vld [vmem:[%s4781_s28 + $0x38] sm:$0xff]  ;;  %v230_v14 = vld [vmem:[%s4781_s28 + $0x40] sm:$0xff] }
  0x14   : > { %3960 = vmatprep.mubr.msk.f32.mxu0 %vm270_vm0, %v224_v8  ;;  %v231_v15 = vld [vmem:[%s4781_s28 + $0x48] sm:$0xff]  ;;  %v232_v16 = vld [vmem:[%s4781_s28 + $0x50] sm:$0xff]  ;;  %v233_v17 = vld [vmem:[%s4781_s28 + $0x58] sm:$0xff]  ;;  %4655 = vmatpush3.bf16.msra.mxu0 %v4881_v55 }
  0x15   : > { %v234_v18 = vld [vmem:[%s4781_s28 + $0x60] sm:$0xff]  ;;  %v235_v19 = vld [vmem:[%s4781_s28 + $0x68] sm:$0xff]  ;;  %v236_v20 = vld [vmem:[%s4781_s28 + $0x70] sm:$0xff]  ;;  %4656 = vmatprep.subr.bf16.mxu0 %v4727_v56 }
  0x16   : > { %v237_v21 = vld [vmem:[%s4781_s28 + $0x78] sm:$0xff]  ;;  %v238_v22 = vld [vmem:[%s4781_s28 + $0x80] sm:$0xff]  ;;  %v239_v23 = vld [vmem:[%s4781_s28 + $0x88] sm:$0xff] }
  0x17   : > { %3961 = vmatmul.mubr.msk.f32.gmra.mrb[2].mxu0 %vm270_vm0, %v225_v9  ;;  %v240_v24 = vld [vmem:[%s4781_s28 + $0x90] sm:$0xff]  ;;  %v241_v25 = vld [vmem:[%s4781_s28 + $0x98] sm:$0xff]  ;;  %v242_v26 = vld [vmem:[%s4781_s28 + $0xa0] sm:$0xff] }
  0x18   : > { %3963 = vmatprep.mubr.msk.f32.mxu0 %vm270_vm0, %v226_v10  ;;  %v243_v27 = vld [vmem:[%s4781_s28 + $0xa8] sm:$0xff]  ;;  %v244_v28 = vld [vmem:[%s4781_s28 + $0xb0] sm:$0xff]  ;;  %v245_v29 = vld [vmem:[%s4781_s28 + $0xb8] sm:$0xff]  ;;  %4658 = vmatpush3.bf16.msra.mxu0 %v4897_v60 }
  0x19   : > { %v246_v30 = vld [vmem:[%s4781_s28 + $0xc0] sm:$0xff]  ;;  %v247_v31 = vld [vmem:[%s4781_s28 + $0xc8] sm:$0xff]  ;;  %v248_v32 = vld [vmem:[%s4781_s28 + $0xd0] sm:$0xff]  ;;  %4665 = vmatprep.subr.bf16.mxu0 %v4727_v56 }
  0x1a   : > { %v249_v33 = vld [vmem:[%s4781_s28 + $0xd8] sm:$0xff]  ;;  %v250_v34 = vld [vmem:[%s4781_s28 + $0xe0] sm:$0xff]  ;;  %v251_v35 = vld [vmem:[%s4781_s28 + $0xe8] sm:$0xff] }
  0x1b   : > { %3964 = vmatmul.mubr.msk.f32.gmra.mrb[4].mxu0 %vm270_vm0, %v227_v11  ;;  %v252_v36 = vld [vmem:[%s4781_s28 + $0xf0] sm:$0xff]  ;;  %v253_v37 = vld [vmem:[%s4781_s28 + $0xf8] sm:$0xff]  ;;  %v254_v38 = vld [vmem:[%s4781_s28 + $0x100] sm:$0xff] }
  0x1c   : > { %3966 = vmatprep.mubr.msk.f32.mxu0 %vm270_vm0, %v228_v12  ;;  %v255_v39 = vld [vmem:[%s4781_s28 + $0x108] sm:$0xff]  ;;  %v256_v40 = vld [vmem:[%s4781_s28 + $0x110] sm:$0xff]  ;;  %v257_v41 = vld [vmem:[%s4781_s28 + $0x118] sm:$0xff] }
  0x1d   : > { %v258_v42 = vld [vmem:[%s4781_s28 + $0x120] sm:$0xff]  ;;  %v259_v43 = vld [vmem:[%s4781_s28 + $0x128] sm:$0xff]  ;;  %v260_v44 = vld [vmem:[%s4781_s28 + $0x130] sm:$0xff] }
  0x1e   : > { %v261_v45 = vld [vmem:[%s4781_s28 + $0x138] sm:$0xff]  ;;  %v262_v46 = vld [vmem:[%s4781_s28 + $0x140] sm:$0xff]  ;;  %v263_v47 = vld [vmem:[%s4781_s28 + $0x148] sm:$0xff] }
  0x1f   : > { %3967 = vmatmul.mubr.msk.f32.gmra.mrb[6].mxu0 %vm270_vm0, %v229_v13  ;;  %v264_v48 = vld [vmem:[%s4781_s28 + $0x150] sm:$0xff]  ;;  %v265_v49 = vld [vmem:[%s4781_s28 + $0x158] sm:$0xff]  ;;  %v266_v50 = vld [vmem:[%s4781_s28 + $0x160] sm:$0xff] }
  0x20   : > { %3969 = vmatprep.mubr.msk.f32.mxu0 %vm270_vm0, %v230_v14  ;;  %v267_v51 = vld [vmem:[%s4781_s28 + $0x168] sm:$0xff]  ;;  %v268_v54 = vld [vmem:[%s4781_s28 + $0x170] sm:$0xff]  ;;  %v269_v57 = vld [vmem:[%s4781_s28 + $0x178] sm:$0xff] }
  0x21   : > { %v3438_v6 = vld [vmem:[%s6109_s2 + $0x40] sm:$0xff]  ;;  %v3439_v7 = vld [vmem:[%s6109_s2 + $0x48] sm:$0xff]  ;;  %v3440_v13 = vld [vmem:[%s6109_s2 + $0x50] sm:$0xff] }
  0x22   : > { %v4919_v11 = vpack.c.bf16 %v3439_v7, %v3438_v6  ;;  %v3441_v14 = vld [vmem:[%s6109_s2 + $0x58] sm:$0xff] }
  0x23   : > { %3970 = vmatmul.mubr.msk.f32.gmra.mrb[8].mxu0 %vm270_vm0, %v231_v15 }
  0x24   : > { %3972 = vmatprep.mubr.msk.f32.mxu0 %vm270_vm0, %v232_v16 }
  0x27   : > { %3973 = vmatmul.mubr.msk.f32.gmra.mrb[10].mxu0 %vm270_vm0, %v233_v17 }
  0x28   : > { %3975 = vmatprep.mubr.msk.f32.mxu0 %vm270_vm0, %v234_v18 }
  0x2b   : > { %3976 = vmatmul.mubr.msk.f32.gmra.mrb[12].mxu0 %vm270_vm0, %v235_v19  ;;  %v4933_v19 = vpack.c.bf16 %v3441_v14, %v3440_v13 }
  0x2c   : > { %3978 = vmatprep.mubr.msk.f32.mxu0 %vm270_vm0, %v236_v20 }
  0x2f   : > { %3979 = vmatmul.mubr.msk.f32.gmra.mrb[14].mxu0 %vm270_vm0, %v237_v21 }
  0x30   : > { %3981 = vmatprep.mubr.msk.f32.mxu0 %vm270_vm0, %v238_v22 }
  0x33   : > { %3982 = vmatmul.mubr.msk.f32.gmra.mrb[16].mxu0 %vm270_vm0, %v239_v23 }
  0x34   : > { %3984 = vmatprep.mubr.msk.f32.mxu0 %vm270_vm0, %v240_v24 }
  0x37   : > { %3985 = vmatmul.mubr.msk.f32.gmra.mrb[18].mxu0 %vm270_vm0, %v241_v25 }
  0x38   : > { %3987 = vmatprep.mubr.msk.f32.mxu0 %vm270_vm0, %v242_v26 }
  0x3b   : > { %3988 = vmatmul.mubr.msk.f32.gmra.mrb[20].mxu0 %vm270_vm0, %v243_v27 }
  0x3c   : > { %3990 = vmatprep.mubr.msk.f32.mxu0 %vm270_vm0, %v244_v28 }
  0x3f   : > { %3991 = vmatmul.mubr.msk.f32.gmra.mrb[22].mxu0 %vm270_vm0, %v245_v29 }
  0x40   : > { %3993 = vmatprep.mubr.msk.f32.mxu0 %vm270_vm0, %v246_v30 }
  0x43   : > { %3994 = vmatmul.mubr.msk.f32.gmra.mrb[24].mxu0 %vm270_vm0, %v247_v31 }
  0x44   : > { %3996 = vmatprep.mubr.msk.f32.mxu0 %vm270_vm0, %v248_v32 }
  0x47   : > { %3997 = vmatmul.mubr.msk.f32.gmra.mrb[26].mxu0 %vm270_vm0, %v249_v33 }
  0x48   : > { %3999 = vmatprep.mubr.msk.f32.mxu0 %vm270_vm0, %v250_v34 }
  0x4b   : > { %4000 = vmatmul.mubr.msk.f32.gmra.mrb[28].mxu0 %vm270_vm0, %v251_v35 }
  0x4c   : > { %4002 = vmatprep.mubr.msk.f32.mxu0 %vm270_vm0, %v252_v36 }
  0x4f   : > { %4003 = vmatmul.mubr.msk.f32.gmra.mrb[30].mxu0 %vm270_vm0, %v253_v37 }
  0x50   : > { %4005 = vmatprep.mubr.msk.f32.mxu0 %vm270_vm0, %v254_v38 }
  0x53   : > { %4006 = vmatmul.mubr.msk.f32.gmra.mrb[32].mxu0 %vm270_vm0, %v255_v39 }
  0x54   : > { %4008 = vmatprep.mubr.msk.f32.mxu0 %vm270_vm0, %v256_v40 }
  0x57   : > { %4009 = vmatmul.mubr.msk.f32.gmra.mrb[34].mxu0 %vm270_vm0, %v257_v41  ;;  %v203_v41 = vld [vmem:[%s6109_s2] sm:$0xff] }
  0x58   : > { %4011 = vmatprep.mubr.msk.f32.mxu0 %vm270_vm0, %v258_v42  ;;  %v204_v42 = vld [vmem:[%s6109_s2 + $0x8] sm:$0xff] }
  0x5b   : > { %4012 = vmatmul.mubr.msk.f32.gmra.mrb[36].mxu0 %vm270_vm0, %v259_v43 }
  0x5c   : > { %4014 = vmatprep.mubr.msk.f32.mxu0 %vm270_vm0, %v260_v44 }
  0x5f   : > { %4015 = vmatmul.mubr.msk.f32.gmra.mrb[38].mxu0 %vm270_vm0, %v261_v45 }
  0x60   : > { %4017 = vmatprep.mubr.msk.f32.mxu0 %vm270_vm0, %v262_v46 }
  0x63   : > { %4018 = vmatmul.mubr.msk.f32.gmra.mrb[40].mxu0 %vm270_vm0, %v263_v47  ;;  %v4969_v47 = vpack.c.bf16 %v204_v42, %v203_v41 }
  0x64   : > { %4020 = vmatprep.mubr.msk.f32.mxu0 %vm270_vm0, %v264_v48 }
  0x67   : > { %4021 = vmatmul.mubr.msk.f32.gmra.mrb[42].mxu0 %vm270_vm0, %v265_v49  ;;  %v205_v49 = vld [vmem:[%s6109_s2 + $0x10] sm:$0xff] }
  0x68   : > { %4023 = vmatprep.mubr.msk.f32.mxu0 %vm270_vm0, %v266_v50  ;;  %v4987_v59 = vpack.c.bf16 %v206_v52, %v205_v49 }
  0x6b   : > { %4024 = vmatmul.mubr.msk.f32.gmra.mrb[44].mxu0 %vm270_vm0, %v267_v51 }
  0x6c   : > { %4026 = vmatprep.mubr.msk.f32.mxu0 %vm270_vm0, %v268_v54 }
  0x6f   : > { %4027 = vmatmul.mubr.msk.f32.gmra.mrb[46].mxu0 %vm270_vm0, %v269_v57 }
  0x70   : > { %4037 = vmatprep.mubr.msk.f32.mxu0 %vm4728_vm1, %v4729_v61 }
  0xe6   : > { %v3959_v62 = vpop.f32.mrb[0].mxu0 }
  0xe7   : > { %v721_v63 = vmax.f32 %v3959_v62, 0.0  ;;  %v481_v0 = vpop.f32.mrb[1].mxu0 }
  0xe8   : > { %v720_v1 = vmax.f32 %v481_v0, 0.0 }
  0xe9   : > { %769 = vst.msk [vmem:[#allocation2 + $0x8] sm:$0xff] %vm270_vm0, %v721_v63 }
  0xea   : > { %768 = vst.msk [vmem:[#allocation2] sm:$0xff] %vm270_vm0, %v720_v1  ;;  %v3962_v2 = vpop.f32.mrb[2].mxu0 }
  0xeb   : > { %v723_v3 = vmax.f32 %v3962_v2, 0.0  ;;  %v491_v4 = vpop.f32.mrb[3].mxu0 }
  0xec   : > { %v722_v5 = vmax.f32 %v491_v4, 0.0 }
  0xed   : > { %771 = vst.msk [vmem:[#allocation2 + $0x18] sm:$0xff] %vm270_vm0, %v723_v3 }
  0xee   : > { %770 = vst.msk [vmem:[#allocation2 + $0x10] sm:$0xff] %vm270_vm0, %v722_v5  ;;  %v3965_v8 = vpop.f32.mrb[4].mxu0 }
  0xef   : > { %v725_v9 = vmax.f32 %v3965_v8, 0.0  ;;  %v501_v10 = vpop.f32.mrb[5].mxu0 }
  0xf0   : > { %v724_v12 = vmax.f32 %v501_v10, 0.0 }
  0xf1   : > { %773 = vst.msk [vmem:[#allocation2 + $0x28] sm:$0xff] %vm270_vm0, %v725_v9  ;;  %v839_v15 = vld [vmem:[#allocation2 + $0x1] sm:$0xff] }
  0xf2   : > { %772 = vst.msk [vmem:[#allocation2 + $0x20] sm:$0xff] %vm270_vm0, %v724_v12  ;;  %v3968_v16 = vpop.f32.mrb[6].mxu0  ;;  %4038 = vmatmul.mubr.msk.f32.vlgmr.msra.gmra.mrb[48].mxu0 %vm270_vm0, %v839_v15 }
  0xf3   : > { %v727_v17 = vmax.f32 %v3968_v16, 0.0  ;;  %v511_v18 = vpop.f32.mrb[7].mxu0  ;;  %4040 = vmatprep.mubr.msk.f32.mxu0 %vm4728_vm1, %v4729_v61  ;;  %4667 = vmatpush3.bf16.msra.mxu0 %v4919_v11 }
  0xf4   : > { %v726_v20 = vmax.f32 %v511_v18, 0.0  ;;  %4668 = vmatprep.subr.bf16.mxu0 %v4727_v56 }
  0xf5   : > { %775 = vst.msk [vmem:[#allocation2 + $0x38] sm:$0xff] %vm270_vm0, %v727_v17  ;;  %v840_v21 = vld [vmem:[#allocation2 + $0x9] sm:$0xff]  ;;  %v841_v26 = vld [vmem:[#allocation2 + $0x11] sm:$0xff] }
  0xf6   : > { %774 = vst.msk [vmem:[#allocation2 + $0x30] sm:$0xff] %vm270_vm0, %v726_v20  ;;  %v3971_v22 = vpop.f32.mrb[8].mxu0  ;;  %4041 = vmatmul.mubr.msk.f32.gmra.mrb[50].mxu0 %vm270_vm0, %v840_v21 }
  0xf7   : > { %v729_v23 = vmax.f32 %v3971_v22, 0.0  ;;  %v521_v24 = vpop.f32.mrb[9].mxu0  ;;  %4043 = vmatprep.mubr.msk.f32.mxu0 %vm4728_vm1, %v4729_v61  ;;  %4670 = vmatpush3.bf16.msra.mxu0 %v4933_v19 }
  0xf8   : > { %v728_v25 = vmax.f32 %v521_v24, 0.0  ;;  %4677 = vmatprep.subr.bf16.mxu0 %v4727_v56 }
  0xf9   : > { %777 = vst.msk [vmem:[#allocation2 + $0x48] sm:$0xff] %vm270_vm0, %v729_v23  ;;  %v842_v31 = vld [vmem:[#allocation2 + $0x19] sm:$0xff]  ;;  %v843_v36 = vld [vmem:[#allocation2 + $0x21] sm:$0xff] }
  0xfa   : > { %776 = vst.msk [vmem:[#allocation2 + $0x40] sm:$0xff] %vm270_vm0, %v728_v25  ;;  %v3974_v27 = vpop.f32.mrb[10].mxu0  ;;  %4044 = vmatmul.mubr.msk.f32.gmra.mrb[52].mxu0 %vm270_vm0, %v841_v26 }
  0xfb   : > { %v731_v28 = vmax.f32 %v3974_v27, 0.0  ;;  %v531_v29 = vpop.f32.mrb[11].mxu0  ;;  %4046 = vmatprep.mubr.msk.f32.mxu0 %vm4728_vm1, %v4729_v61 }
  0xfc   : > { %v730_v30 = vmax.f32 %v531_v29, 0.0 }
  0xfd   : > { %779 = vst.msk [vmem:[#allocation2 + $0x58] sm:$0xff] %vm270_vm0, %v731_v28  ;;  %v844_v43 = vld [vmem:[#allocation2 + $0x29] sm:$0xff]  ;;  %v845_v50 = vld [vmem:[#allocation2 + $0x31] sm:$0xff] }
  0xfe   : > { %778 = vst.msk [vmem:[#allocation2 + $0x50] sm:$0xff] %vm270_vm0, %v730_v30  ;;  %v3977_v32 = vpop.f32.mrb[12].mxu0  ;;  %4047 = vmatmul.mubr.msk.f32.gmra.mrb[54].mxu0 %vm270_vm0, %v842_v31 }
  0xff   : > { %v733_v33 = vmax.f32 %v3977_v32, 0.0  ;;  %v541_v34 = vpop.f32.mrb[13].mxu0  ;;  %4049 = vmatprep.mubr.msk.f32.mxu0 %vm4728_vm1, %v4729_v61 }
 0x100   : > { %v732_v35 = vmax.f32 %v541_v34, 0.0 }
 0x101   : > { %781 = vst.msk [vmem:[#allocation2 + $0x68] sm:$0xff] %vm270_vm0, %v733_v33  ;;  %v846_v62 = vld [vmem:[#allocation2 + $0x39] sm:$0xff]  ;;  %v847_v4 = vld [vmem:[#allocation2 + $0x41] sm:$0xff] }
 0x102   : > { %780 = vst.msk [vmem:[#allocation2 + $0x60] sm:$0xff] %vm270_vm0, %v732_v35  ;;  %v3980_v37 = vpop.f32.mrb[14].mxu0  ;;  %4050 = vmatmul.mubr.msk.f32.gmra.mrb[56].mxu0 %vm270_vm0, %v843_v36 }
 0x103   : > { %v735_v38 = vmax.f32 %v3980_v37, 0.0  ;;  %v551_v39 = vpop.f32.mrb[15].mxu0  ;;  %4052 = vmatprep.mubr.msk.f32.mxu0 %vm4728_vm1, %v4729_v61 }
 0x104   : > { %v734_v40 = vmax.f32 %v551_v39, 0.0 }
 0x105   : > { %783 = vst.msk [vmem:[#allocation2 + $0x78] sm:$0xff] %vm270_vm0, %v735_v38  ;;  %v848_v10 = vld [vmem:[#allocation2 + $0x49] sm:$0xff]  ;;  %v849_v17 = vld [vmem:[#allocation2 + $0x51] sm:$0xff] }
 0x106   : > { %782 = vst.msk [vmem:[#allocation2 + $0x70] sm:$0xff] %vm270_vm0, %v734_v40  ;;  %v3983_v44 = vpop.f32.mrb[16].mxu0  ;;  %4053 = vmatmul.mubr.msk.f32.gmra.mrb[58].mxu0 %vm270_vm0, %v844_v43 }
 0x107   : > { %v737_v45 = vmax.f32 %v3983_v44, 0.0  ;;  %v561_v46 = vpop.f32.mrb[17].mxu0  ;;  %4055 = vmatprep.mubr.msk.f32.mxu0 %vm4728_vm1, %v4729_v61 }
 0x108   : > { %v736_v48 = vmax.f32 %v561_v46, 0.0 }
 0x109   : > { %785 = vst.msk [vmem:[#allocation2 + $0x88] sm:$0xff] %vm270_vm0, %v737_v45  ;;  %v850_v51 = vld [vmem:[#allocation2 + $0x59] sm:$0xff]  ;;  %v851_v63 = vld [vmem:[#allocation2 + $0x61] sm:$0xff] }
 0x10a   : > { %784 = vst.msk [vmem:[#allocation2 + $0x80] sm:$0xff] %vm270_vm0, %v736_v48  ;;  %4056 = vmatmul.mubr.msk.f32.gmra.mrb[60].mxu0 %vm270_vm0, %v845_v50  ;;  %4071 = vmatmul.mubr.msk.f32.vlgmr.msra.gmra.mrb[0].mxu1 %vm270_vm0, %v850_v51  ;;  %v3986_v53 = vpop.f32.mrb[18].mxu0 }
 0x10b   : > { %4661 = vmatpush3.bf16.msra.mxu1 %v4969_v47  ;;  %v739_v54 = vmax.f32 %v3986_v53, 0.0  ;;  %4058 = vmatprep.mubr.msk.f32.mxu0 %vm4728_vm1, %v4729_v61  ;;  %v571_v57 = vpop.f32.mrb[19].mxu0 }
 0x10c   : > { %4073 = vmatprep.mubr.msk.f32.mxu1 %vm4728_vm1, %v4729_v61  ;;  %v738_v58 = vmax.f32 %v571_v57, 0.0  ;;  %4662 = vmatprep.subr.bf16.mxu1 %v4727_v56 }
 0x10d   : > { %787 = vst.msk [vmem:[#allocation2 + $0x98] sm:$0xff] %vm270_vm0, %v739_v54  ;;  %v852_v5 = vld [vmem:[#allocation2 + $0x69] sm:$0xff]  ;;  %v853_v12 = vld [vmem:[#allocation2 + $0x71] sm:$0xff] }
 0x10e   : > { %786 = vst.msk [vmem:[#allocation2 + $0x90] sm:$0xff] %vm270_vm0, %v738_v58  ;;  %4059 = vmatmul.mubr.msk.f32.gmra.mrb[62].mxu0 %vm270_vm0, %v846_v62  ;;  %4074 = vmatmul.mubr.msk.f32.gmra.mrb[2].mxu1 %vm270_vm0, %v851_v63  ;;  %v3989_v0 = vpop.f32.mrb[20].mxu0  ;;  %v3442_v63 = vld [vmem:[%s6109_s2 + $0x60] sm:$0xff] }
 0x10f   : > { %4061 = vmatprep.mubr.msk.f32.mxu0 %vm4728_vm1, %v4729_v61  ;;  %4076 = vmatprep.mubr.msk.f32.mxu1 %vm4728_vm1, %v4729_v61  ;;  %v741_v1 = vmax.f32 %v3989_v0, 0.0  ;;  %v581_v2 = vpop.f32.mrb[21].mxu0  ;;  %v3443_v0 = vld [vmem:[%s6109_s2 + $0x68] sm:$0xff] }
 0x110   : > { %v740_v3 = vmax.f32 %v581_v2, 0.0  ;;  %4664 = vmatpush3.bf16.msra.mxu1 %v4987_v59 }
 0x111   : > { %789 = vst.msk [vmem:[#allocation2 + $0xa8] sm:$0xff] %vm270_vm0, %v741_v1  ;;  %4671 = vmatprep.subr.bf16.mxu1 %v4727_v56  ;;  %v854_v18 = vld [vmem:[#allocation2 + $0x79] sm:$0xff]  ;;  %v855_v24 = vld [vmem:[#allocation2 + $0x81] sm:$0xff] }
 0x112   : > { %4062 = vmatmul.mubr.msk.f32.gmra.mrb[64].mxu0 %vm270_vm0, %v847_v4  ;;  %4077 = vmatmul.mubr.msk.f32.gmra.mrb[4].mxu1 %vm270_vm0, %v852_v5  ;;  %788 = vst.msk [vmem:[#allocation2 + $0xa0] sm:$0xff] %vm270_vm0, %v740_v3  ;;  %v3992_v6 = vpop.f32.mrb[22].mxu0  ;;  %v5106_v5 = vpack.c.bf16 %v3443_v0, %v3442_v63  ;;  %v830_v0 = vld [vmem:[#allocation2 + $0x70] sm:$0xff] }
 0x113   : > { %v743_v7 = vmax.f32 %v3992_v6, 0.0  ;;  %4064 = vmatprep.mubr.msk.f32.mxu0 %vm4728_vm1, %v4729_v61  ;;  %4079 = vmatprep.mubr.msk.f32.mxu1 %vm4728_vm1, %v4729_v61  ;;  %v591_v8 = vpop.f32.mrb[23].mxu0 }
 0x114   : > { %v742_v9 = vmax.f32 %v591_v8, 0.0 }
 0x115   : > { %791 = vst.msk [vmem:[#allocation2 + $0xb8] sm:$0xff] %vm270_vm0, %v743_v7  ;;  %v856_v30 = vld [vmem:[#allocation2 + $0x89] sm:$0xff]  ;;  %v857_v35 = vld [vmem:[#allocation2 + $0x91] sm:$0xff] }
 0x116   : > { %790 = vst.msk [vmem:[#allocation2 + $0xb0] sm:$0xff] %vm270_vm0, %v742_v9  ;;  %4065 = vmatmul.mubr.msk.f32.gmra.mrb[66].mxu0 %vm270_vm0, %v848_v10  ;;  %4080 = vmatmul.mubr.msk.f32.gmra.mrb[6].mxu1 %vm270_vm0, %v853_v12  ;;  %v3995_v13 = vpop.f32.mrb[24].mxu0  ;;  %v816_v9 = vld [vmem:[#allocation2] sm:$0xff]  ;;  %v3444_v10 = vld [vmem:[%s6109_s2 + $0x70] sm:$0xff]  ;;  %v3445_v12 = vld [vmem:[%s6109_s2 + $0x78] sm:$0xff] }
 0x117   : > { %v745_v14 = vmax.f32 %v3995_v13, 0.0  ;;  %v601_v15 = vpop.f32.mrb[25].mxu0  ;;  %4067 = vmatprep.mubr.msk.f32.mxu0 %vm4728_vm1, %v4729_v61  ;;  %4082 = vmatprep.mubr.msk.f32.mxu1 %vm4728_vm1, %v4729_v61 }
 0x118   : > { %v744_v16 = vmax.f32 %v601_v15, 0.0 }
 0x119   : > { %793 = vst.msk [vmem:[#allocation2 + $0xc8] sm:$0xff] %vm270_vm0, %v745_v14  ;;  %v858_v41 = vld [vmem:[#allocation2 + $0x99] sm:$0xff]  ;;  %v859_v46 = vld [vmem:[#allocation2 + $0xa1] sm:$0xff] }
 0x11a   : > { %792 = vst.msk [vmem:[#allocation2 + $0xc0] sm:$0xff] %vm270_vm0, %v744_v16  ;;  %v3998_v20 = vpop.f32.mrb[26].mxu0  ;;  %4068 = vmatmul.mubr.msk.f32.gmra.mrb[68].mxu0 %vm270_vm0, %v849_v17  ;;  %4083 = vmatmul.mubr.msk.f32.gmra.mrb[8].mxu1 %vm270_vm0, %v854_v18  ;;  %v5127_v18 = vpack.c.bf16 %v3445_v12, %v3444_v10  ;;  %v834_v10 = vld [vmem:[#allocation2 + $0x90] sm:$0xff] }
 0x11b   : > { %v747_v21 = vmax.f32 %v3998_v20, 0.0  ;;  %v611_v22 = vpop.f32.mrb[27].mxu0  ;;  %4085 = vmatprep.mubr.msk.f32.mxu1 %vm4728_vm1, %v4729_v61  ;;  %4191 = vmatprep.mubr.msk.f32.mxu0 %vm4728_vm1, %v4729_v61  ;;  %v817_v20 = vld [vmem:[#allocation2 + $0x8] sm:$0xff] }
 0x11c   : > { %v746_v23 = vmax.f32 %v611_v22, 0.0 }
 0x11d   : > { %795 = vst.msk [vmem:[#allocation2 + $0xd8] sm:$0xff] %vm270_vm0, %v747_v21  ;;  %v860_v53 = vld [vmem:[#allocation2 + $0xa9] sm:$0xff]  ;;  %v861_v2 = vld [vmem:[#allocation2 + $0xb1] sm:$0xf] }
 0x11e   : > { %794 = vst.msk [vmem:[#allocation2 + $0xd0] sm:$0xff] %vm270_vm0, %v746_v23  ;;  %4086 = vmatmul.mubr.msk.f32.gmra.mrb[10].mxu1 %vm270_vm0, %v855_v24  ;;  %v4001_v25 = vpop.f32.mrb[28].mxu0 }
 0x11f   : > { %4088 = vmatprep.mubr.msk.f32.mxu1 %vm4728_vm1, %v4729_v61  ;;  %v749_v26 = vmax.f32 %v4001_v25, 0.0  ;;  %v621_v27 = vpop.f32.mrb[29].mxu0 }
 0x120   : > { %v5028_v28 = vld [vmem:[#allocation2 + $0xc8] sm:$0xff]  ;;  %v748_v29 = vmax.f32 %v621_v27, 0.0 }
 0x121   : > { %797 = vst.msk [vmem:[#allocation2 + $0xe8] sm:$0xff] %vm270_vm0, %v749_v26  ;;  %4192 = vmatmul.mubr.msk.f32.vlgmr.msra.gmra.mrb[70].mxu0 %vm270_vm0, %v5028_v28  ;;  %v818_v26 = vld [vmem:[#allocation2 + $0x10] sm:$0xff] }
 0x122   : > { %4089 = vmatmul.mubr.msk.f32.gmra.mrb[12].mxu1 %vm270_vm0, %v856_v30  ;;  %796 = vst.msk [vmem:[#allocation2 + $0xe0] sm:$0xff] %vm270_vm0, %v748_v29  ;;  %4194 = vmatprep.mubr.msk.f32.mxu0 %vm4728_vm1, %v4729_v61  ;;  %v4004_v31 = vpop.f32.mrb[30].mxu0 }
 0x123   : > { %4091 = vmatprep.mubr.msk.f32.mxu1 %vm4728_vm1, %v4729_v61  ;;  %v751_v32 = vmax.f32 %v4004_v31, 0.0  ;;  %v631_v33 = vpop.f32.mrb[31].mxu0  ;;  %4679 = vmatpush3.bf16.msra.mxu0 %v4881_v55 }
 0x124   : > { %v750_v34 = vmax.f32 %v631_v33, 0.0  ;;  %4680 = vmatprep.subr.bf16.mxu0 %v4727_v56  ;;  %v5052_v55 = vld [vmem:[#allocation2 + $0xd8] sm:$0xff] }
 0x125   : > { %v5041_v36 = vld [vmem:[#allocation2 + $0xd0] sm:$0xff]  ;;  %799 = vst.msk [vmem:[#allocation2 + $0xf8] sm:$0xff] %vm270_vm0, %v751_v32  ;;  %v819_v33 = vld [vmem:[#allocation2 + $0x18] sm:$0xff] }
 0x126   : > { %4092 = vmatmul.mubr.msk.f32.gmra.mrb[14].mxu1 %vm270_vm0, %v857_v35  ;;  %4195 = vmatmul.mubr.msk.f32.gmra.mrb[72].mxu0 %vm270_vm0, %v5041_v36  ;;  %798 = vst.msk [vmem:[#allocation2 + $0xf0] sm:$0xff] %vm270_vm0, %v750_v34  ;;  %v4007_v37 = vpop.f32.mrb[32].mxu0  ;;  %v820_v35 = vld [vmem:[#allocation2 + $0x20] sm:$0xff] }
 0x127   : > { %4094 = vmatprep.mubr.msk.f32.mxu1 %vm4728_vm1, %v4729_v61  ;;  %4197 = vmatprep.mubr.msk.f32.mxu0 %vm4728_vm1, %v4729_v61  ;;  %v753_v38 = vmax.f32 %v4007_v37, 0.0  ;;  %v641_v39 = vpop.f32.mrb[33].mxu0 }
 0x128   : > { %v752_v40 = vmax.f32 %v641_v39, 0.0  ;;  %4682 = vmatpush3.bf16.msra.mxu0 %v4897_v60  ;;  %v5076_v49 = vld [vmem:[#allocation2 + $0xe8] sm:$0xff] }
 0x129   : > { %801 = vst.msk [vmem:[#allocation2 + $0x108] sm:$0xff] %vm270_vm0, %v753_v38  ;;  %4689 = vmatprep.subr.bf16.mxu0 %v4727_v56  ;;  %v5065_v60 = vld [vmem:[#allocation2 + $0xe0] sm:$0xff]  ;;  %v821_v38 = vld [vmem:[#allocation2 + $0x28] sm:$0xff] }
 0x12a   : > { %4095 = vmatmul.mubr.msk.f32.gmra.mrb[16].mxu1 %vm270_vm0, %v858_v41  ;;  %4198 = vmatmul.mubr.msk.f32.gmra.mrb[74].mxu0 %vm270_vm0, %v5052_v55  ;;  %800 = vst.msk [vmem:[#allocation2 + $0x100] sm:$0xff] %vm270_vm0, %v752_v40  ;;  %v4010_v42 = vpop.f32.mrb[34].mxu0  ;;  %v822_v40 = vld [vmem:[#allocation2 + $0x30] sm:$0xff]  ;;  %v2051_v12 = vld [vmem:[#allocation2 + $0xd9] sm:$0xff] }
 0x12b   : > { %4097 = vmatprep.mubr.msk.f32.mxu1 %vm4728_vm1, %v4729_v61  ;;  %4200 = vmatprep.mubr.msk.f32.mxu0 %vm4728_vm1, %v4729_v61  ;;  %v755_v43 = vmax.f32 %v4010_v42, 0.0  ;;  %v651_v44 = vpop.f32.mrb[35].mxu0  ;;  %v823_v42 = vld [vmem:[#allocation2 + $0x38] sm:$0xff] }
 0x12c   : > { %v754_v45 = vmax.f32 %v651_v44, 0.0  ;;  %v5104_v4 = vld [vmem:[#allocation2 + $0xf8] sm:$0xff]  ;;  %v824_v44 = vld [vmem:[#allocation2 + $0x40] sm:$0xff] }
 0x12d   : > { %803 = vst.msk [vmem:[#allocation2 + $0x118] sm:$0xff] %vm270_vm0, %v755_v43  ;;  %v5087_v57 = vld [vmem:[#allocation2 + $0xf0] sm:$0xff] }
 0x12e   : > { %4098 = vmatmul.mubr.msk.f32.gmra.mrb[18].mxu1 %vm270_vm0, %v859_v46  ;;  %4201 = vmatmul.mubr.msk.f32.gmra.mrb[76].mxu0 %vm270_vm0, %v5065_v60  ;;  %802 = vst.msk [vmem:[#allocation2 + $0x110] sm:$0xff] %vm270_vm0, %v754_v45  ;;  %v4013_v48 = vpop.f32.mrb[36].mxu0  ;;  %v825_v46 = vld [vmem:[#allocation2 + $0x48] sm:$0xff] }
 0x12f   : > { %4100 = vmatprep.mubr.msk.f32.mxu1 %vm4728_vm1, %v4729_v61  ;;  %4203 = vmatprep.mubr.msk.f32.mxu0 %vm4728_vm1, %v4729_v61  ;;  %v757_v50 = vmax.f32 %v4013_v48, 0.0  ;;  %v661_v51 = vpop.f32.mrb[37].mxu0 }
 0x130   : > { %v756_v52 = vmax.f32 %v661_v51, 0.0  ;;  %v5138_v22 = vld [vmem:[#allocation2 + $0x108] sm:$0xff] }
 0x131   : > { %805 = vst.msk [vmem:[#allocation2 + $0x128] sm:$0xff] %vm270_vm0, %v757_v50  ;;  %v5122_v14 = vld [vmem:[#allocation2 + $0x100] sm:$0xff]  ;;  %v826_v50 = vld [vmem:[#allocation2 + $0x50] sm:$0xff] }
 0x132   : > { %4101 = vmatmul.mubr.msk.f32.gmra.mrb[20].mxu1 %vm270_vm0, %v860_v53  ;;  %4204 = vmatmul.mubr.msk.f32.gmra.mrb[78].mxu0 %vm270_vm0, %v5076_v49  ;;  %804 = vst.msk [vmem:[#allocation2 + $0x120] sm:$0xff] %vm270_vm0, %v756_v52  ;;  %v4016_v54 = vpop.f32.mrb[38].mxu0  ;;  %v827_v52 = vld [vmem:[#allocation2 + $0x58] sm:$0xff] }
 0x133   : > { %4103 = vmatprep.mubr.msk.f32.mxu1 %vm4728_vm1, %v4729_v61  ;;  %4206 = vmatprep.mubr.msk.f32.mxu0 %vm4728_vm1, %v4729_v61  ;;  %v759_v58 = vmax.f32 %v4016_v54, 0.0  ;;  %v671_v62 = vpop.f32.mrb[39].mxu0  ;;  %v828_v54 = vld [vmem:[#allocation2 + $0x60] sm:$0xff] }
 0x134   : > { %v758_v1 = vmax.f32 %v671_v62, 0.0  ;;  %v5162_v34 = vld [vmem:[#allocation2 + $0x118] sm:$0xff]  ;;  %v829_v62 = vld [vmem:[#allocation2 + $0x68] sm:$0xff] }
 0x135   : > { %807 = vst.msk [vmem:[#allocation2 + $0x138] sm:$0xff] %vm270_vm0, %v759_v58  ;;  %v5151_v29 = vld [vmem:[#allocation2 + $0x110] sm:$0xff] }
 0x136   : > { %4104 = vmatmul.mubr.msk.f32.gmra.mrb[22].mxu1 %vm270_vm0, %v861_v2  ;;  %4207 = vmatmul.mubr.msk.f32.gmra.mrb[80].mxu0 %vm270_vm0, %v5087_v57  ;;  %806 = vst.msk [vmem:[#allocation2 + $0x130] sm:$0xff] %vm270_vm0, %v758_v1  ;;  %v4019_v3 = vpop.f32.mrb[40].mxu0  ;;  %v831_v2 = vld [vmem:[#allocation2 + $0x78] sm:$0xff] }
 0x137   : > { %4114 = vmatprep.mubr.msk.f32.mxu1 %vm4728_vm1, %v4729_v61  ;;  %4209 = vmatprep.mubr.msk.f32.mxu0 %vm4728_vm1, %v4729_v61  ;;  %v761_v6 = vmax.f32 %v4019_v3, 0.0  ;;  %v681_v7 = vpop.f32.mrb[41].mxu0 }
 0x138   : > { %v760_v8 = vmax.f32 %v681_v7, 0.0  ;;  %v5180_v39 = vld [vmem:[#allocation2 + $0x128] sm:$0xff] }
 0x139   : > { %809 = vst.msk [vmem:[#allocation2 + $0x148] sm:$0xff] %vm270_vm0, %v761_v6  ;;  %v5171_v37 = vld [vmem:[#allocation2 + $0x120] sm:$0xff]  ;;  %v2049_v7 = vld [vmem:[#allocation2 + $0xc9] sm:$0xff] }
 0x13a   : > { %4115 = vmatmul.mubr.msk.f32.vlgmr.msra.gmra.mrb[24].mxu1 %vm270_vm0, %v816_v9  ;;  %4210 = vmatmul.mubr.msk.f32.gmra.mrb[82].mxu0 %vm270_vm0, %v5104_v4  ;;  %808 = vst.msk [vmem:[#allocation2 + $0x140] sm:$0xff] %vm270_vm0, %v760_v8  ;;  %v4022_v13 = vpop.f32.mrb[42].mxu0  ;;  %v832_v6 = vld [vmem:[#allocation2 + $0x80] sm:$0xff]  ;;  %v833_v8 = vld [vmem:[#allocation2 + $0x88] sm:$0xff]  ;;  %v2050_v9 = vld [vmem:[#allocation2 + $0xd1] sm:$0xff] }
 0x13b   : > { %4673 = vmatpush3.bf16.msra.mxu1 %v5106_v5  ;;  %4117 = vmatprep.mubr.msk.f32.mxu1 %vm4728_vm1, %v4729_v61  ;;  %v763_v15 = vmax.f32 %v4022_v13, 0.0  ;;  %v691_v16 = vpop.f32.mrb[43].mxu0  ;;  %v835_v13 = vld [vmem:[#allocation2 + $0x98] sm:$0xff] }
 0x13c   : > { %4212 = vmatprep.mubr.msk.f32.mxu0 %vm4728_vm1, %v4729_v61  ;;  %v762_v17 = vmax.f32 %v691_v16, 0.0  ;;  %4674 = vmatprep.subr.bf16.mxu1 %v4727_v56  ;;  %v5198_v43 = vld [vmem:[#allocation2 + $0x138] sm:$0xff]  ;;  %v837_v16 = vld [vmem:[#allocation2 + $0xa8] sm:$0xff] }
 0x13d   : > { %811 = vst.msk [vmem:[#allocation2 + $0x158] sm:$0xff] %vm270_vm0, %v763_v15  ;;  %v5189_v41 = vld [vmem:[#allocation2 + $0x130] sm:$0xff]  ;;  %v836_v15 = vld [vmem:[#allocation2 + $0xa0] sm:$0xff] }
 0x13e   : > { %4118 = vmatmul.mubr.msk.f32.gmra.mrb[26].mxu1 %vm270_vm0, %v817_v20  ;;  %4213 = vmatmul.mubr.msk.f32.gmra.mrb[84].mxu0 %vm270_vm0, %v5122_v14  ;;  %810 = vst.msk [vmem:[#allocation2 + $0x150] sm:$0xff] %vm270_vm0, %v762_v17  ;;  %v4025_v21 = vpop.f32.mrb[44].mxu0  ;;  %v2054_v17 = vld [vmem:[#allocation2 + $0xf1] sm:$0xff] }
 0x13f   : > { %4120 = vmatprep.mubr.msk.f32.mxu1 %vm4728_vm1, %v4729_v61  ;;  %4215 = vmatprep.mubr.msk.f32.mxu0 %vm4728_vm1, %v4729_v61  ;;  %v765_v23 = vmax.f32 %v4025_v21, 0.0  ;;  %v701_v24 = vpop.f32.mrb[45].mxu0  ;;  %v838_v20 = vld [vmem:[#allocation2 + $0xb0] sm:$0xf]  ;;  %v2055_v21 = vld [vmem:[#allocation2 + $0xf9] sm:$0xff] }
 0x140   : > { %v764_v25 = vmax.f32 %v701_v24, 0.0  ;;  %4676 = vmatpush3.bf16.msra.mxu1 %v5127_v18  ;;  %v5216_v48 = vld [vmem:[#allocation2 + $0x148] sm:$0xff]  ;;  %v2058_v24 = vld [vmem:[#allocation2 + $0x111] sm:$0xff] }
 0x141   : > { %813 = vst.msk [vmem:[#allocation2 + $0x168] sm:$0xff] %vm270_vm0, %v765_v23  ;;  %4683 = vmatprep.subr.bf16.mxu1 %v4727_v56  ;;  %v5207_v45 = vld [vmem:[#allocation2 + $0x140] sm:$0xff] }
 0x142   : > { %4121 = vmatmul.mubr.msk.f32.gmra.mrb[28].mxu1 %vm270_vm0, %v818_v26  ;;  %4216 = vmatmul.mubr.msk.f32.gmra.mrb[86].mxu0 %vm270_vm0, %v5138_v22  ;;  %812 = vst.msk [vmem:[#allocation2 + $0x160] sm:$0xff] %vm270_vm0, %v764_v25  ;;  %v4028_v27 = vpop.f32.mrb[46].mxu0  ;;  %v2056_v23 = vld [vmem:[#allocation2 + $0x101] sm:$0xff]  ;;  %v2061_v26 = vld [vmem:[#allocation2 + $0x129] sm:$0xff] }
 0x143   : > { %4123 = vmatprep.mubr.msk.f32.mxu1 %vm4728_vm1, %v4729_v61  ;;  %4218 = vmatprep.mubr.msk.f32.mxu0 %vm4728_vm1, %v4729_v61  ;;  %v767_v30 = vmax.f32 %v4028_v27, 0.0  ;;  %v711_v31 = vpop.f32.mrb[47].mxu0  ;;  %v2060_v25 = vld [vmem:[#allocation2 + $0x121] sm:$0xff]  ;;  %v2062_v27 = vld [vmem:[#allocation2 + $0x131] sm:$0xff] }
 0x144   : > { %v766_v32 = vmax.f32 %v711_v31, 0.0  ;;  %v5234_v53 = vld [vmem:[#allocation2 + $0x158] sm:$0xff]  ;;  %v2064_v31 = vld [vmem:[#allocation2 + $0x141] sm:$0xff] }
 0x145   : > { %815 = vst.msk [vmem:[#allocation2 + $0x178] sm:$0xff] %vm270_vm0, %v767_v30  ;;  %v5225_v51 = vld [vmem:[#allocation2 + $0x150] sm:$0xff]  ;;  %v2063_v30 = vld [vmem:[#allocation2 + $0x139] sm:$0xff] }
 0x146   : > { %4124 = vmatmul.mubr.msk.f32.gmra.mrb[30].mxu1 %vm270_vm0, %v819_v33  ;;  %4219 = vmatmul.mubr.msk.f32.gmra.mrb[88].mxu0 %vm270_vm0, %v5151_v29  ;;  %814 = vst.msk [vmem:[#allocation2 + $0x170] sm:$0xff] %vm270_vm0, %v766_v32  ;;  %v2065_v32 = vld [vmem:[#allocation2 + $0x149] sm:$0xff]  ;;  %v2066_v33 = vld [vmem:[#allocation2 + $0x151] sm:$0xff] }
 0x147   : > { %4126 = vmatprep.mubr.msk.f32.mxu1 %vm4728_vm1, %v4729_v61  ;;  %4221 = vmatprep.mubr.msk.f32.mxu0 %vm4728_vm1, %v4729_v61 }
 0x148   : > { %v5252_v63 = vld [vmem:[#allocation2 + $0x168] sm:$0xff] }
 0x149   : > { %v5243_v58 = vld [vmem:[#allocation2 + $0x160] sm:$0xff] }
 0x14a   : > { %4127 = vmatmul.mubr.msk.f32.gmra.mrb[32].mxu1 %vm270_vm0, %v820_v35  ;;  %4222 = vmatmul.mubr.msk.f32.gmra.mrb[90].mxu0 %vm270_vm0, %v5162_v34  ;;  %v2067_v35 = vld [vmem:[#allocation2 + $0x159] sm:$0xff] }
 0x14b   : > { %4129 = vmatprep.mubr.msk.f32.mxu1 %vm4728_vm1, %v4729_v61  ;;  %4224 = vmatprep.mubr.msk.f32.mxu0 %vm4728_vm1, %v4729_v61 }
 0x14c   : > { %v1382_v3 = vld [vmem:[#allocation2 + $0x178] sm:$0xf] }
 0x14d   : > { %v5261_v1 = vld [vmem:[#allocation2 + $0x170] sm:$0xff] }
 0x14e   : > { %4130 = vmatmul.mubr.msk.f32.gmra.mrb[34].mxu1 %vm270_vm0, %v821_v38  ;;  %4225 = vmatmul.mubr.msk.f32.gmra.mrb[92].mxu0 %vm270_vm0, %v5171_v37 }
 0x14f   : > { %4132 = vmatprep.mubr.msk.f32.mxu1 %vm4728_vm1, %v4729_v61  ;;  %4227 = vmatprep.mubr.msk.f32.mxu0 %vm4728_vm1, %v4729_v61 }
 0x152   : > { %4133 = vmatmul.mubr.msk.f32.gmra.mrb[36].mxu1 %vm270_vm0, %v822_v40  ;;  %4228 = vmatmul.mubr.msk.f32.gmra.mrb[94].mxu0 %vm270_vm0, %v5180_v39 }
 0x153   : > { %4135 = vmatprep.mubr.msk.f32.mxu1 %vm4728_vm1, %v4729_v61  ;;  %4230 = vmatprep.mubr.msk.f32.mxu0 %vm4728_vm1, %v4729_v61 }
 0x156   : > { %4136 = vmatmul.mubr.msk.f32.gmra.mrb[38].mxu1 %vm270_vm0, %v823_v42  ;;  %4231 = vmatmul.mubr.msk.f32.gmra.mrb[96].mxu0 %vm270_vm0, %v5189_v41  ;;  %v2068_v42 = vld [vmem:[#allocation2 + $0x161] sm:$0xff] }
 0x157   : > { %4138 = vmatprep.mubr.msk.f32.mxu1 %vm4728_vm1, %v4729_v61  ;;  %4233 = vmatprep.mubr.msk.f32.mxu0 %vm4728_vm1, %v4729_v61 }
 0x15a   : > { %4139 = vmatmul.mubr.msk.f32.gmra.mrb[40].mxu1 %vm270_vm0, %v824_v44  ;;  %4234 = vmatmul.mubr.msk.f32.gmra.mrb[98].mxu0 %vm270_vm0, %v5198_v43 }
 0x15b   : > { %4141 = vmatprep.mubr.msk.f32.mxu1 %vm4728_vm1, %v4729_v61  ;;  %4236 = vmatprep.mubr.msk.f32.mxu0 %vm4728_vm1, %v4729_v61 }
 0x15e   : > { %4142 = vmatmul.mubr.msk.f32.gmra.mrb[42].mxu1 %vm270_vm0, %v825_v46  ;;  %4237 = vmatmul.mubr.msk.f32.gmra.mrb[100].mxu0 %vm270_vm0, %v5207_v45 }
 0x15f   : > { %4144 = vmatprep.mubr.msk.f32.mxu1 %vm4728_vm1, %v4729_v61  ;;  %4239 = vmatprep.mubr.msk.f32.mxu0 %vm4728_vm1, %v4729_v61 }
 0x162   : > { %4145 = vmatmul.mubr.msk.f32.gmra.mrb[44].mxu1 %vm270_vm0, %v826_v50  ;;  %4240 = vmatmul.mubr.msk.f32.gmra.mrb[102].mxu0 %vm270_vm0, %v5216_v48  ;;  %v2069_v50 = vld [vmem:[#allocation2 + $0x169] sm:$0xff] }
 0x163   : > { %4147 = vmatprep.mubr.msk.f32.mxu1 %vm4728_vm1, %v4729_v61  ;;  %4242 = vmatprep.mubr.msk.f32.mxu0 %vm4728_vm1, %v4729_v61 }
 0x166   : > { %4148 = vmatmul.mubr.msk.f32.gmra.mrb[46].mxu1 %vm270_vm0, %v827_v52  ;;  %4243 = vmatmul.mubr.msk.f32.gmra.mrb[104].mxu0 %vm270_vm0, %v5225_v51 }
 0x167   : > { %4150 = vmatprep.mubr.msk.f32.mxu1 %vm4728_vm1, %v4729_v61  ;;  %4245 = vmatprep.mubr.msk.f32.mxu0 %vm4728_vm1, %v4729_v61 }
 0x16a   : > { %4151 = vmatmul.mubr.msk.f32.gmra.mrb[48].mxu1 %vm270_vm0, %v828_v54  ;;  %4246 = vmatmul.mubr.msk.f32.gmra.mrb[106].mxu0 %vm270_vm0, %v5234_v53 }
 0x16b   : > { %4153 = vmatprep.mubr.msk.f32.mxu1 %vm4728_vm1, %v4729_v61  ;;  %4248 = vmatprep.mubr.msk.f32.mxu0 %vm4728_vm1, %v4729_v61 }
 0x16e   : > { %4154 = vmatmul.mubr.msk.f32.gmra.mrb[50].mxu1 %vm270_vm0, %v829_v62  ;;  %4249 = vmatmul.mubr.msk.f32.gmra.mrb[108].mxu0 %vm270_vm0, %v5243_v58  ;;  %v2070_v62 = vld [vmem:[#allocation2 + $0x171] sm:$0xff] }
 0x16f   : > { %4156 = vmatprep.mubr.msk.f32.mxu1 %vm4728_vm1, %v4729_v61  ;;  %4251 = vmatprep.mubr.msk.f32.mxu0 %vm4728_vm1, %v4729_v61 }
 0x172   : > { %4157 = vmatmul.mubr.msk.f32.gmra.mrb[52].mxu1 %vm270_vm0, %v830_v0  ;;  %4252 = vmatmul.mubr.msk.f32.gmra.mrb[110].mxu0 %vm270_vm0, %v5252_v63 }
 0x173   : > { %4159 = vmatprep.mubr.msk.f32.mxu1 %vm4728_vm1, %v4729_v61  ;;  %4254 = vmatprep.mubr.msk.f32.mxu0 %vm4728_vm1, %v4729_v61 }
 0x176   : > { %4160 = vmatmul.mubr.msk.f32.gmra.mrb[54].mxu1 %vm270_vm0, %v831_v2  ;;  %4255 = vmatmul.mubr.msk.f32.gmra.mrb[112].mxu0 %vm270_vm0, %v5261_v1 }
 0x177   : > { %4162 = vmatprep.mubr.msk.f32.mxu1 %vm4728_vm1, %v4729_v61  ;;  %4257 = vmatprep.mubr.msk.f32.mxu0 %vm4728_vm1, %v4729_v61 }
 0x17a   : > { %4163 = vmatmul.mubr.msk.f32.gmra.mrb[56].mxu1 %vm270_vm0, %v832_v6  ;;  %4258 = vmatmul.mubr.msk.f32.gmra.mrb[114].mxu0 %vm270_vm0, %v1382_v3  ;;  %v2071_v3 = vld [vmem:[#allocation2 + $0x179] sm:$0xf] }
 0x17b   : > { %4165 = vmatprep.mubr.msk.f32.mxu1 %vm4728_vm1, %v4729_v61  ;;  %4345 = vmatprep.mubr.msk.f32.mxu0 %vm4728_vm1, %v4729_v61 }
 0x17e   : > { %4166 = vmatmul.mubr.msk.f32.gmra.mrb[58].mxu1 %vm270_vm0, %v833_v8  ;;  %4346 = vmatmul.mubr.msk.f32.vlgmr.msra.gmra.mrb[116].mxu0 %vm270_vm0, %v2049_v7 }
 0x17f   : > { %4168 = vmatprep.mubr.msk.f32.mxu1 %vm4728_vm1, %v4729_v61  ;;  %4348 = vmatprep.mubr.msk.f32.mxu0 %vm4728_vm1, %v4729_v61 }
 0x180   : > { %4691 = vmatpush3.bf16.msra.mxu0 %v4919_v11  ;;  %v2052_v11 = vld [vmem:[#allocation2 + $0xe1] sm:$0xff] }
 0x181   : > { %4692 = vmatprep.subr.bf16.mxu0 %v4727_v56 }
 0x182   : > { %4169 = vmatmul.mubr.msk.f32.gmra.mrb[60].mxu1 %vm270_vm0, %v834_v10  ;;  %4349 = vmatmul.mubr.msk.f32.gmra.mrb[118].mxu0 %vm270_vm0, %v2050_v9 }
 0x183   : > { %4171 = vmatprep.mubr.msk.f32.mxu1 %vm4728_vm1, %v4729_v61  ;;  %4351 = vmatprep.mubr.msk.f32.mxu0 %vm4728_vm1, %v4729_v61 }
 0x184   : > { %4694 = vmatpush3.bf16.msra.mxu0 %v4933_v19  ;;  %v2053_v19 = vld [vmem:[#allocation2 + $0xe9] sm:$0xff] }
 0x186   : > { %4172 = vmatmul.mubr.msk.f32.gmra.mrb[62].mxu1 %vm270_vm0, %v835_v13  ;;  %4352 = vmatmul.mubr.msk.f32.gmra.mrb[120].mxu0 %vm270_vm0, %v2051_v12 }
 0x187   : > { %4174 = vmatprep.mubr.msk.f32.mxu1 %vm4728_vm1, %v4729_v61  ;;  %4354 = vmatprep.mubr.msk.f32.mxu0 %vm4728_vm1, %v4729_v61 }
 0x18a   : > { %4175 = vmatmul.mubr.msk.f32.gmra.mrb[64].mxu1 %vm270_vm0, %v836_v15  ;;  %4355 = vmatmul.mubr.msk.f32.gmra.mrb[122].mxu0 %vm270_vm0, %v2052_v11 }
 0x18b   : > { %4177 = vmatprep.mubr.msk.f32.mxu1 %vm4728_vm1, %v4729_v61  ;;  %4357 = vmatprep.mubr.msk.f32.mxu0 %vm4728_vm1, %v4729_v61 }
 0x18e   : > { %4178 = vmatmul.mubr.msk.f32.gmra.mrb[66].mxu1 %vm270_vm0, %v837_v16  ;;  %4358 = vmatmul.mubr.msk.f32.gmra.mrb[124].mxu0 %vm270_vm0, %v2053_v19 }
 0x18f   : > { %4180 = vmatprep.mubr.msk.f32.mxu1 %vm4728_vm1, %v4729_v61  ;;  %4360 = vmatprep.mubr.msk.f32.mxu0 %vm4728_vm1, %v4729_v61 }
 0x192   : > { %4181 = vmatmul.mubr.msk.f32.gmra.mrb[68].mxu1 %vm270_vm0, %v838_v20  ;;  %4361 = vmatmul.mubr.msk.f32.gmra.mrb[126].mxu0 %vm270_vm0, %v2054_v17  ;;  %v2572_v20 = vld [vmem:[#allocation2 + $0x24] sm:$0xff] }
 0x193   : > { %4268 = vmatprep.mubr.msk.f32.mxu1 %vm4728_vm1, %v4729_v61  ;;  %4363 = vmatprep.mubr.msk.f32.mxu0 %vm4728_vm1, %v4729_v61 }
 0x196   : > { %4269 = vmatmul.mubr.msk.f32.vlgmr.msra.gmra.mrb[70].mxu1 %vm270_vm0, %v2049_v7  ;;  %4364 = vmatmul.mubr.msk.f32.gmra.mrb[128].mxu0 %vm270_vm0, %v2055_v21 }
 0x197   : > { %4685 = vmatpush3.bf16.msra.mxu1 %v4969_v47  ;;  %4271 = vmatprep.mubr.msk.f32.mxu1 %vm4728_vm1, %v4729_v61  ;;  %v2057_v47 = vld [vmem:[#allocation2 + $0x109] sm:$0xff] }
 0x198   : > { %4366 = vmatprep.mubr.msk.f32.mxu0 %vm4728_vm1, %v4729_v61  ;;  %4686 = vmatprep.subr.bf16.mxu1 %v4727_v56 }
 0x19a   : > { %4272 = vmatmul.mubr.msk.f32.gmra.mrb[72].mxu1 %vm270_vm0, %v2050_v9  ;;  %4367 = vmatmul.mubr.msk.f32.gmra.mrb[130].mxu0 %vm270_vm0, %v2056_v23  ;;  %v2570_v9 = vld [vmem:[#allocation2 + $0x14] sm:$0xff] }
 0x19b   : > { %4274 = vmatprep.mubr.msk.f32.mxu1 %vm4728_vm1, %v4729_v61  ;;  %4369 = vmatprep.mubr.msk.f32.mxu0 %vm4728_vm1, %v4729_v61 }
 0x19c   : > { %4688 = vmatpush3.bf16.msra.mxu1 %v4987_v59  ;;  %v2059_v59 = vld [vmem:[#allocation2 + $0x119] sm:$0xff] }
 0x19d   : > { %4695 = vmatprep.subr.bf16.mxu1 %v4727_v56 }
 0x19e   : > { %4275 = vmatmul.mubr.msk.f32.gmra.mrb[74].mxu1 %vm270_vm0, %v2051_v12  ;;  %4370 = vmatmul.mubr.msk.f32.gmra.mrb[132].mxu0 %vm270_vm0, %v2057_v47 }
 0x19f   : > { %4277 = vmatprep.mubr.msk.f32.mxu1 %vm4728_vm1, %v4729_v61  ;;  %4372 = vmatprep.mubr.msk.f32.mxu0 %vm4728_vm1, %v4729_v61 }
 0x1a2   : > { %4278 = vmatmul.mubr.msk.f32.gmra.mrb[76].mxu1 %vm270_vm0, %v2052_v11  ;;  %4373 = vmatmul.mubr.msk.f32.gmra.mrb[134].mxu0 %vm270_vm0, %v2058_v24  ;;  %v2571_v11 = vld [vmem:[#allocation2 + $0x1c] sm:$0xff] }
 0x1a3   : > { %4280 = vmatprep.mubr.msk.f32.mxu1 %vm4728_vm1, %v4729_v61  ;;  %4375 = vmatprep.mubr.msk.f32.mxu0 %vm4728_vm1, %v4729_v61 }
 0x1a6   : > { %4281 = vmatmul.mubr.msk.f32.gmra.mrb[78].mxu1 %vm270_vm0, %v2053_v19  ;;  %4376 = vmatmul.mubr.msk.f32.gmra.mrb[136].mxu0 %vm270_vm0, %v2059_v59 }
 0x1a7   : > { %4283 = vmatprep.mubr.msk.f32.mxu1 %vm4728_vm1, %v4729_v61  ;;  %4378 = vmatprep.mubr.msk.f32.mxu0 %vm4728_vm1, %v4729_v61 }
 0x1aa   : > { %4284 = vmatmul.mubr.msk.f32.gmra.mrb[80].mxu1 %vm270_vm0, %v2054_v17  ;;  %4379 = vmatmul.mubr.msk.f32.gmra.mrb[138].mxu0 %vm270_vm0, %v2060_v25 }
 0x1ab   : > { %4286 = vmatprep.mubr.msk.f32.mxu1 %vm4728_vm1, %v4729_v61  ;;  %4381 = vmatprep.mubr.msk.f32.mxu0 %vm4728_vm1, %v4729_v61 }
 0x1ae   : > { %4287 = vmatmul.mubr.msk.f32.gmra.mrb[82].mxu1 %vm270_vm0, %v2055_v21  ;;  %4382 = vmatmul.mubr.msk.f32.gmra.mrb[140].mxu0 %vm270_vm0, %v2061_v26 }
 0x1af   : > { %4289 = vmatprep.mubr.msk.f32.mxu1 %vm4728_vm1, %v4729_v61  ;;  %4384 = vmatprep.mubr.msk.f32.mxu0 %vm4728_vm1, %v4729_v61 }
 0x1b2   : > { %4290 = vmatmul.mubr.msk.f32.gmra.mrb[84].mxu1 %vm270_vm0, %v2056_v23  ;;  %4385 = vmatmul.mubr.msk.f32.gmra.mrb[142].mxu0 %vm270_vm0, %v2062_v27 }
 0x1b3   : > { %4292 = vmatprep.mubr.msk.f32.mxu1 %vm4728_vm1, %v4729_v61  ;;  %4387 = vmatprep.mubr.msk.f32.mxu0 %vm4728_vm1, %v4729_v61 }
 0x1b6   : > { %4293 = vmatmul.mubr.msk.f32.gmra.mrb[86].mxu1 %vm270_vm0, %v2057_v47  ;;  %4388 = vmatmul.mubr.msk.f32.gmra.mrb[144].mxu0 %vm270_vm0, %v2063_v30 }
 0x1b7   : > { %4295 = vmatprep.mubr.msk.f32.mxu1 %vm4728_vm1, %v4729_v61  ;;  %4390 = vmatprep.mubr.msk.f32.mxu0 %vm4728_vm1, %v4729_v61 }
 0x1ba   : > { %4296 = vmatmul.mubr.msk.f32.gmra.mrb[88].mxu1 %vm270_vm0, %v2058_v24  ;;  %4391 = vmatmul.mubr.msk.f32.gmra.mrb[146].mxu0 %vm270_vm0, %v2064_v31 }
 0x1bb   : > { %4298 = vmatprep.mubr.msk.f32.mxu1 %vm4728_vm1, %v4729_v61  ;;  %4393 = vmatprep.mubr.msk.f32.mxu0 %vm4728_vm1, %v4729_v61 }
 0x1be   : > { %4299 = vmatmul.mubr.msk.f32.gmra.mrb[90].mxu1 %vm270_vm0, %v2059_v59  ;;  %4394 = vmatmul.mubr.msk.f32.gmra.mrb[148].mxu0 %vm270_vm0, %v2065_v32  ;;  %v2573_v59 = vld [vmem:[#allocation2 + $0x2c] sm:$0xff] }
 0x1bf   : > { %4301 = vmatprep.mubr.msk.f32.mxu1 %vm4728_vm1, %v4729_v61  ;;  %4396 = vmatprep.mubr.msk.f32.mxu0 %vm4728_vm1, %v4729_v61 }
 0x1c2   : > { %4302 = vmatmul.mubr.msk.f32.gmra.mrb[92].mxu1 %vm270_vm0, %v2060_v25  ;;  %4397 = vmatmul.mubr.msk.f32.gmra.mrb[150].mxu0 %vm270_vm0, %v2066_v33 }
 0x1c3   : > { %4304 = vmatprep.mubr.msk.f32.mxu1 %vm4728_vm1, %v4729_v61  ;;  %4399 = vmatprep.mubr.msk.f32.mxu0 %vm4728_vm1, %v4729_v61 }
 0x1c5   : > { %v5391_v38 = vpop.f32.mrb[48].mxu0 }
 0x1c6   : > { %v4039_v40 = vpop.f32.mrb[49].mxu0  ;;  %4305 = vmatmul.mubr.msk.f32.gmra.mrb[94].mxu1 %vm270_vm0, %v2061_v26  ;;  %4400 = vmatmul.mubr.msk.f32.gmra.mrb[152].mxu0 %vm270_vm0, %v2067_v35 }
 0x1c7   : > { %4307 = vmatprep.mubr.msk.f32.mxu1 %vm4728_vm1, %v4729_v61  ;;  %4402 = vmatprep.mubr.msk.f32.mxu0 %vm4728_vm1, %v4729_v61 }
 0x1c9   : > { %v5399_v44 = vpop.f32.mrb[50].mxu0 }
 0x1ca   : > { %v4042_v46 = vpop.f32.mrb[51].mxu0  ;;  %4308 = vmatmul.mubr.msk.f32.gmra.mrb[96].mxu1 %vm270_vm0, %v2062_v27  ;;  %4403 = vmatmul.mubr.msk.f32.gmra.mrb[154].mxu0 %vm270_vm0, %v2068_v42 }
 0x1cb   : > { %4310 = vmatprep.mubr.msk.f32.mxu1 %vm4728_vm1, %v4729_v61  ;;  %4405 = vmatprep.mubr.msk.f32.mxu0 %vm4728_vm1, %v4729_v61  ;;  %v2575_v46 = vld [vmem:[#allocation2 + $0x3c] sm:$0xff] }
 0x1cd   : > { %v5407_v52 = vpop.f32.mrb[52].mxu0 }
 0x1ce   : > { %v4045_v54 = vpop.f32.mrb[53].mxu0  ;;  %4311 = vmatmul.mubr.msk.f32.gmra.mrb[98].mxu1 %vm270_vm0, %v2063_v30  ;;  %4406 = vmatmul.mubr.msk.f32.gmra.mrb[156].mxu0 %vm270_vm0, %v2069_v50 }
 0x1cf   : > { %4313 = vmatprep.mubr.msk.f32.mxu1 %vm4728_vm1, %v4729_v61  ;;  %4408 = vmatprep.mubr.msk.f32.mxu0 %vm4728_vm1, %v4729_v61 }
 0x1d1   : > { %v5415_v0 = vpop.f32.mrb[54].mxu0 }
 0x1d2   : > { %v4048_v2 = vpop.f32.mrb[55].mxu0  ;;  %4314 = vmatmul.mubr.msk.f32.gmra.mrb[100].mxu1 %vm270_vm0, %v2064_v31  ;;  %4409 = vmatmul.mubr.msk.f32.gmra.mrb[158].mxu0 %vm270_vm0, %v2070_v62  ;;  %v2574_v31 = vld [vmem:[#allocation2 + $0x34] sm:$0xff] }
 0x1d3   : > { %4316 = vmatprep.mubr.msk.f32.mxu1 %vm4728_vm1, %v4729_v61  ;;  %4411 = vmatprep.mubr.msk.f32.mxu0 %vm4728_vm1, %v4729_v61  ;;  %v2576_v2 = vld [vmem:[#allocation2 + $0x44] sm:$0xff] }
 0x1d5   : > { %v5423_v6 = vpop.f32.mrb[56].mxu0 }
 0x1d6   : > { %v4051_v7 = vpop.f32.mrb[57].mxu0  ;;  %4317 = vmatmul.mubr.msk.f32.gmra.mrb[102].mxu1 %vm270_vm0, %v2065_v32  ;;  %4412 = vmatmul.mubr.msk.f32.gmra.mrb[160].mxu0 %vm270_vm0, %v2071_v3 }
 0x1d7   : > { %4319 = vmatprep.mubr.msk.f32.mxu1 %vm4728_vm1, %v4729_v61  ;;  %4499 = vmatprep.mubr.msk.f32.mxu0 %vm4728_vm1, %v4729_v61 }
 0x1d9   : > { %v5431_v8 = vpop.f32.mrb[58].mxu0 }
 0x1da   : > { %v4054_v10 = vpop.f32.mrb[59].mxu0  ;;  %4320 = vmatmul.mubr.msk.f32.gmra.mrb[104].mxu1 %vm270_vm0, %v2066_v33  ;;  %4500 = vmatmul.mubr.msk.f32.vlgmr.msra.gmra.mrb[162].mxu0 %vm270_vm0, %v2570_v9 }
 0x1db   : > { %4322 = vmatprep.mubr.msk.f32.mxu1 %vm4728_vm1, %v4729_v61  ;;  %4502 = vmatprep.mubr.msk.f32.mxu0 %vm4728_vm1, %v4729_v61  ;;  %v2577_v10 = vld [vmem:[#allocation2 + $0x4c] sm:$0xff] }
 0x1dd   : > { %v5439_v12 = vpop.f32.mrb[60].mxu0  ;;  %v5441_v13 = vpop.f32.mrb[0].mxu1 }
 0x1de   : > { %v4057_v15 = vpop.f32.mrb[61].mxu0  ;;  %v4072_v19 = vpop.f32.mrb[1].mxu1  ;;  %4323 = vmatmul.mubr.msk.f32.gmra.mrb[106].mxu1 %vm270_vm0, %v2067_v35  ;;  %4503 = vmatmul.mubr.msk.f32.gmra.mrb[164].mxu0 %vm270_vm0, %v2571_v11 }
 0x1df   : > { %4325 = vmatprep.mubr.msk.f32.mxu1 %vm4728_vm1, %v4729_v61  ;;  %4505 = vmatprep.mubr.msk.f32.mxu0 %vm4728_vm1, %v4729_v61 }
 0x1e1   : > { %v5449_v16 = vpop.f32.mrb[62].mxu0  ;;  %v5451_v17 = vpop.f32.mrb[2].mxu1 }
 0x1e2   : > { %v4060_v21 = vpop.f32.mrb[63].mxu0  ;;  %v4075_v23 = vpop.f32.mrb[3].mxu1  ;;  %4326 = vmatmul.mubr.msk.f32.gmra.mrb[108].mxu1 %vm270_vm0, %v2068_v42  ;;  %4506 = vmatmul.mubr.msk.f32.gmra.mrb[166].mxu0 %vm270_vm0, %v2572_v20  ;;  %v1677_v42 = vld [vmem:[#allocation2 + $0x179] sm:$0xf] }
 0x1e3   : > { %4328 = vmatprep.mubr.msk.f32.mxu1 %vm4728_vm1, %v4729_v61  ;;  %4508 = vmatprep.mubr.msk.f32.mxu0 %vm4728_vm1, %v4729_v61 }
 0x1e5   : > { %v5459_v47 = vpop.f32.mrb[64].mxu0  ;;  %v5461_v24 = vpop.f32.mrb[4].mxu1 }
 0x1e6   : > { %v4063_v25 = vpop.f32.mrb[65].mxu0  ;;  %v4078_v26 = vpop.f32.mrb[5].mxu1  ;;  %4329 = vmatmul.mubr.msk.f32.gmra.mrb[110].mxu1 %vm270_vm0, %v2069_v50  ;;  %4509 = vmatmul.mubr.msk.f32.gmra.mrb[168].mxu0 %vm270_vm0, %v2573_v59 }
 0x1e7   : > { %4331 = vmatprep.mubr.msk.f32.mxu1 %vm4728_vm1, %v4729_v61  ;;  %4511 = vmatprep.mubr.msk.f32.mxu0 %vm4728_vm1, %v4729_v61  ;;  %v2580_v25 = vld [vmem:[#allocation2 + $0x64] sm:$0xff] }
 0x1e9   : > { %v5469_v27 = vpop.f32.mrb[66].mxu0  ;;  %v5471_v30 = vpop.f32.mrb[6].mxu1 }
 0x1ea   : > { %v4066_v32 = vpop.f32.mrb[67].mxu0  ;;  %v4081_v33 = vpop.f32.mrb[7].mxu1  ;;  %4332 = vmatmul.mubr.msk.f32.gmra.mrb[112].mxu1 %vm270_vm0, %v2070_v62  ;;  %4512 = vmatmul.mubr.msk.f32.gmra.mrb[170].mxu0 %vm270_vm0, %v2574_v31 }
 0x1eb   : > { %4334 = vmatprep.mubr.msk.f32.mxu1 %vm4728_vm1, %v4729_v61  ;;  %4514 = vmatprep.mubr.msk.f32.mxu0 %vm4728_vm1, %v4729_v61  ;;  %v2581_v33 = vld [vmem:[#allocation2 + $0x6c] sm:$0xff] }
 0x1ed   : > { %v5479_v35 = vpop.f32.mrb[68].mxu0  ;;  %v5481_v40 = vpop.f32.mrb[8].mxu1 }
 0x1ee   : > { %v4069_v50 = vpop.f32.mrb[69].mxu0  ;;  %v4084_v54 = vpop.f32.mrb[9].mxu1  ;;  %4335 = vmatmul.mubr.msk.f32.gmra.mrb[114].mxu1 %vm270_vm0, %v1677_v42  ;;  %4515 = vmatmul.mubr.msk.f32.gmra.mrb[172].mxu0 %vm270_vm0, %v2575_v46 }
 0x1ef   : > { %4422 = vmatprep.mubr.msk.f32.mxu1 %vm4728_vm1, %v4729_v61  ;;  %4517 = vmatprep.mubr.msk.f32.mxu0 %vm4728_vm1, %v4729_v61  ;;  %v2582_v54 = vld [vmem:[#allocation2 + $0x74] sm:$0xff] }
 0x1f1   : > { %v5489_v62 = vpop.f32.mrb[10].mxu1 }
 0x1f2   : > { %v4087_v3 = vpop.f32.mrb[11].mxu1  ;;  %4423 = vmatmul.mubr.msk.f32.vlgmr.msra.gmra.mrb[116].mxu1 %vm270_vm0, %v5028_v28  ;;  %4518 = vmatmul.mubr.msk.f32.gmra.mrb[174].mxu0 %vm270_vm0, %v2576_v2 }
 0x1f3   : > { %4697 = vmatpush3.bf16.msra.mxu1 %v5106_v5  ;;  %4425 = vmatprep.mubr.msk.f32.mxu1 %vm4728_vm1, %v4729_v61 }
 0x1f4   : > { %4520 = vmatprep.mubr.msk.f32.mxu0 %vm4728_vm1, %v4729_v61  ;;  %v5499_v7 = vpop.f32.mrb[70].mxu0  ;;  %4698 = vmatprep.subr.bf16.mxu1 %v4727_v56  ;;  %v2578_v56 = vld [vmem:[#allocation2 + $0x54] sm:$0xff] }
 0x1f5   : > { %v5502_v9 = vpop.f32.mrb[12].mxu1  ;;  %v4193_v11 = vpop.f32.mrb[71].mxu0 }
 0x1f6   : > { %v4090_v15 = vpop.f32.mrb[13].mxu1  ;;  %4426 = vmatmul.mubr.msk.f32.gmra.mrb[118].mxu1 %vm270_vm0, %v5041_v36  ;;  %4521 = vmatmul.mubr.msk.f32.gmra.mrb[176].mxu0 %vm270_vm0, %v2577_v10  ;;  %v2583_v11 = vld [vmem:[#allocation2 + $0x7c] sm:$0xff] }
 0x1f7   : > { %4428 = vmatprep.mubr.msk.f32.mxu1 %vm4728_vm1, %v4729_v61  ;;  %4523 = vmatprep.mubr.msk.f32.mxu0 %vm4728_vm1, %v4729_v61 }
 0x1f8   : > { %4700 = vmatpush3.bf16.msra.mxu1 %v5127_v18  ;;  %v2579_v18 = vld [vmem:[#allocation2 + $0x5c] sm:$0xff] }
 0x1f9   : > { %v5512_v28 = vpop.f32.mrb[14].mxu1  ;;  %v5514_v5 = vpop.f32.mrb[72].mxu0 }
 0x1fa   : > { %v4093_v19 = vpop.f32.mrb[15].mxu1  ;;  %4429 = vmatmul.mubr.msk.f32.gmra.mrb[120].mxu1 %vm270_vm0, %v5052_v55  ;;  %4524 = vmatmul.mubr.msk.f32.gmra.mrb[178].mxu0 %vm270_vm0, %v2578_v56  ;;  %v4196_v36 = vpop.f32.mrb[73].mxu0 }
 0x1fb   : > { %4431 = vmatprep.mubr.msk.f32.mxu1 %vm4728_vm1, %v4729_v61  ;;  %4526 = vmatprep.mubr.msk.f32.mxu0 %vm4728_vm1, %v4729_v61 }
 0x1fd   : > { %v5523_v20 = vpop.f32.mrb[16].mxu1  ;;  %v5525_v21 = vpop.f32.mrb[74].mxu0 }
 0x1fe   : > { %v4096_v23 = vpop.f32.mrb[17].mxu1  ;;  %4432 = vmatmul.mubr.msk.f32.gmra.mrb[122].mxu1 %vm270_vm0, %v5065_v60  ;;  %4527 = vmatmul.mubr.msk.f32.gmra.mrb[180].mxu0 %vm270_vm0, %v2579_v18  ;;  %v4199_v55 = vpop.f32.mrb[75].mxu0 }
 0x1ff   : > { %4434 = vmatprep.mubr.msk.f32.mxu1 %vm4728_vm1, %v4729_v61  ;;  %4529 = vmatprep.mubr.msk.f32.mxu0 %vm4728_vm1, %v4729_v61  ;;  %v2584_v23 = vld [vmem:[#allocation2 + $0x84] sm:$0xff] }
 0x201   : > { %v5534_v59 = vpop.f32.mrb[18].mxu1  ;;  %v5536_v26 = vpop.f32.mrb[76].mxu0 }
 0x202   : > { %v4099_v31 = vpop.f32.mrb[19].mxu1  ;;  %4435 = vmatmul.mubr.msk.f32.gmra.mrb[124].mxu1 %vm270_vm0, %v5076_v49  ;;  %4530 = vmatmul.mubr.msk.f32.gmra.mrb[182].mxu0 %vm270_vm0, %v2580_v25  ;;  %v4202_v60 = vpop.f32.mrb[77].mxu0 }
 0x203   : > { %4437 = vmatprep.mubr.msk.f32.mxu1 %vm4728_vm1, %v4729_v61  ;;  %4532 = vmatprep.mubr.msk.f32.mxu0 %vm4728_vm1, %v4729_v61  ;;  %v2585_v60 = vld [vmem:[#allocation2 + $0x8c] sm:$0xff] }
 0x205   : > { %v5545_v32 = vpop.f32.mrb[20].mxu1  ;;  %v5547_v42 = vpop.f32.mrb[78].mxu0 }
 0x206   : > { %v4102_v46 = vpop.f32.mrb[21].mxu1  ;;  %4438 = vmatmul.mubr.msk.f32.gmra.mrb[126].mxu1 %vm270_vm0, %v5087_v57  ;;  %4533 = vmatmul.mubr.msk.f32.gmra.mrb[184].mxu0 %vm270_vm0, %v2581_v33  ;;  %v4205_v49 = vpop.f32.mrb[79].mxu0 }
 0x207   : > { %4440 = vmatprep.mubr.msk.f32.mxu1 %vm4728_vm1, %v4729_v61  ;;  %4535 = vmatprep.mubr.msk.f32.mxu0 %vm4728_vm1, %v4729_v61 }
 0x209   : > { %v5556_v50 = vpop.f32.mrb[22].mxu1  ;;  %v5558_v2 = vpop.f32.mrb[80].mxu0 }
 0x20a   : > { %v4105_v3 = vpop.f32.mrb[23].mxu1  ;;  %4441 = vmatmul.mubr.msk.f32.gmra.mrb[128].mxu1 %vm270_vm0, %v5104_v4  ;;  %4536 = vmatmul.mubr.msk.f32.gmra.mrb[186].mxu0 %vm270_vm0, %v2582_v54  ;;  %v4208_v57 = vpop.f32.mrb[81].mxu0  ;;  %v2586_v54 = vld [vmem:[#allocation2 + $0x94] sm:$0xff] }
 0x20b   : > { %4443 = vmatprep.mubr.msk.f32.mxu1 %vm4728_vm1, %v4729_v61  ;;  %4538 = vmatprep.mubr.msk.f32.mxu0 %vm4728_vm1, %v4729_v61 }
 0x20d   : > { %v1246_v10 = vpop.f32.mrb[24].mxu1  ;;  %v5567_v15 = vpop.f32.mrb[82].mxu0 }
 0x20e   : > { %v1247_v56 = vadd.f32 %v1246_v10, %v5391_v38  ;;  %v4116_v19 = vpop.f32.mrb[25].mxu1  ;;  %4444 = vmatmul.mubr.msk.f32.gmra.mrb[130].mxu1 %vm270_vm0, %v5122_v14  ;;  %4539 = vmatmul.mubr.msk.f32.gmra.mrb[188].mxu0 %vm270_vm0, %v2583_v11  ;;  %v4211_v4 = vpop.f32.mrb[83].mxu0  ;;  %v2587_v11 = vld [vmem:[#allocation2 + $0x9c] sm:$0xff] }
 0x20f   : > { %4446 = vmatprep.mubr.msk.f32.mxu1 %vm4728_vm1, %v4729_v61  ;;  %4541 = vmatprep.mubr.msk.f32.mxu0 %vm4728_vm1, %v4729_v61 }
 0x210   : > { %v5578_v36 = vadd.f32 %v5499_v7, %v1247_v56 }
 0x211   : > { %v1251_v18 = vpop.f32.mrb[26].mxu1  ;;  %v5580_v55 = vpop.f32.mrb[84].mxu0 }
 0x212   : > { %v1252_v38 = vadd.f32 %v1251_v18, %v5399_v44  ;;  %v4119_v25 = vpop.f32.mrb[27].mxu1  ;;  %4447 = vmatmul.mubr.msk.f32.gmra.mrb[132].mxu1 %vm270_vm0, %v5138_v22  ;;  %4542 = vmatmul.mubr.msk.f32.gmra.mrb[190].mxu0 %vm270_vm0, %v2584_v23  ;;  %v4214_v14 = vpop.f32.mrb[85].mxu0  ;;  %v2588_v18 = vld [vmem:[#allocation2 + $0xa4] sm:$0xff] }
 0x213   : > { %4449 = vmatprep.mubr.msk.f32.mxu1 %vm4728_vm1, %v4729_v61  ;;  %4544 = vmatprep.mubr.msk.f32.mxu0 %vm4728_vm1, %v4729_v61  ;;  %v2589_v14 = vld [vmem:[#allocation2 + $0xac] sm:$0xff] }
 0x214   : > { %v5591_v7 = vadd.f32 %v5514_v5, %v1252_v38 }
 0x215   : > { %v1256_v31 = vpop.f32.mrb[28].mxu1  ;;  %v5593_v33 = vpop.f32.mrb[86].mxu0 }
 0x216   : > { %v1257_v44 = vadd.f32 %v1256_v31, %v5407_v52  ;;  %v4122_v46 = vpop.f32.mrb[29].mxu1  ;;  %4450 = vmatmul.mubr.msk.f32.gmra.mrb[134].mxu1 %vm270_vm0, %v5151_v29  ;;  %4545 = vmatmul.mubr.msk.f32.gmra.mrb[192].mxu0 %vm270_vm0, %v2585_v60  ;;  %v4217_v22 = vpop.f32.mrb[87].mxu0 }
 0x217   : > { %4452 = vmatprep.mubr.msk.f32.mxu1 %vm4728_vm1, %v4729_v61  ;;  %4547 = vmatprep.mubr.msk.f32.mxu0 %vm4728_vm1, %v4729_v61  ;;  %v2590_v46 = vld [vmem:[#allocation2 + $0xb4] sm:$0xff] }
 0x218   : > { %v5604_v5 = vadd.f32 %v5525_v21, %v1257_v44 }
 0x219   : > { %v1261_v49 = vpop.f32.mrb[30].mxu1  ;;  %v5606_v3 = vpop.f32.mrb[88].mxu0 }
 0x21a   : > { %v1262_v52 = vadd.f32 %v1261_v49, %v5415_v0  ;;  %v4125_v57 = vpop.f32.mrb[31].mxu1  ;;  %4453 = vmatmul.mubr.msk.f32.gmra.mrb[136].mxu1 %vm270_vm0, %v5162_v34  ;;  %4548 = vmatmul.mubr.msk.f32.gmra.mrb[194].mxu0 %vm270_vm0, %v2586_v54  ;;  %v4220_v29 = vpop.f32.mrb[89].mxu0 }
 0x21b   : > { %4455 = vmatprep.mubr.msk.f32.mxu1 %vm4728_vm1, %v4729_v61  ;;  %4550 = vmatprep.mubr.msk.f32.mxu0 %vm4728_vm1, %v4729_v61 }
 0x21c   : > { %v5617_v21 = vadd.f32 %v5536_v26, %v1262_v52  ;;  %v2591_v52 = vld [vmem:[#allocation2 + $0xbc] sm:$0xff] }
 0x21d   : > { %v1266_v10 = vpop.f32.mrb[32].mxu1  ;;  %v5619_v56 = vpop.f32.mrb[90].mxu0 }
 0x21e   : > { %v1267_v0 = vadd.f32 %v1266_v10, %v5423_v6  ;;  %v4128_v19 = vpop.f32.mrb[33].mxu1  ;;  %4456 = vmatmul.mubr.msk.f32.gmra.mrb[138].mxu1 %vm270_vm0, %v5171_v37  ;;  %4551 = vmatmul.mubr.msk.f32.gmra.mrb[196].mxu0 %vm270_vm0, %v2587_v11  ;;  %v4223_v34 = vpop.f32.mrb[91].mxu0  ;;  %v2592_v11 = vld [vmem:[#allocation2 + $0xc4] sm:$0xf] }
 0x21f   : > { %4458 = vmatprep.mubr.msk.f32.mxu1 %vm4728_vm1, %v4729_v61  ;;  %4553 = vmatprep.mubr.msk.f32.mxu0 %vm4728_vm1, %v4729_v61 }
 0x220   : > { %v5630_v26 = vadd.f32 %v5547_v42, %v1267_v0 }
 0x221   : > { %v1271_v4 = vpop.f32.mrb[34].mxu1  ;;  %v5632_v23 = vpop.f32.mrb[92].mxu0 }
 0x222   : > { %v1272_v6 = vadd.f32 %v1271_v4, %v5431_v8  ;;  %v4131_v38 = vpop.f32.mrb[35].mxu1  ;;  %4459 = vmatmul.mubr.msk.f32.gmra.mrb[140].mxu1 %vm270_vm0, %v5180_v39  ;;  %4554 = vmatmul.mubr.msk.f32.gmra.mrb[198].mxu0 %vm270_vm0, %v2588_v18  ;;  %v4226_v37 = vpop.f32.mrb[93].mxu0 }
 0x223   : > { %4461 = vmatprep.mubr.msk.f32.mxu1 %vm4728_vm1, %v4729_v61  ;;  %4556 = vmatprep.mubr.msk.f32.mxu0 %vm4728_vm1, %v4729_v61 }
 0x224   : > { %v5643_v42 = vadd.f32 %v5558_v2, %v1272_v6 }
 0x225   : > { %v1276_v25 = vpop.f32.mrb[36].mxu1  ;;  %v5645_v31 = vpop.f32.mrb[94].mxu0 }
 0x226   : > { %v1277_v8 = vadd.f32 %v1276_v25, %v5439_v12  ;;  %v4134_v60 = vpop.f32.mrb[37].mxu1  ;;  %4462 = vmatmul.mubr.msk.f32.gmra.mrb[142].mxu1 %vm270_vm0, %v5189_v41  ;;  %4557 = vmatmul.mubr.msk.f32.gmra.mrb[200].mxu0 %vm270_vm0, %v2589_v14  ;;  %v4229_v39 = vpop.f32.mrb[95].mxu0 }
 0x227   : > { %4464 = vmatprep.mubr.msk.f32.mxu1 %vm4728_vm1, %v4729_v61  ;;  %4559 = vmatprep.mubr.msk.f32.mxu0 %vm4728_vm1, %v4729_v61 }
 0x228   : > { %v5656_v2 = vadd.f32 %v5567_v15, %v1277_v8 }
 0x229   : > { %v1281_v44 = vpop.f32.mrb[38].mxu1  ;;  %v1583_v22 = vpop.f32.mrb[96].mxu0 }
 0x22a   : > { %v1282_v12 = vadd.f32 %v1281_v44, %v5449_v16  ;;  %v4137_v49 = vpop.f32.mrb[39].mxu1  ;;  %4465 = vmatmul.mubr.msk.f32.gmra.mrb[144].mxu1 %vm270_vm0, %v5198_v43  ;;  %4560 = vmatmul.mubr.msk.f32.gmra.mrb[202].mxu0 %vm270_vm0, %v2590_v46  ;;  %v4232_v41 = vpop.f32.mrb[97].mxu0 }
 0x22b   : > { %4467 = vmatprep.mubr.msk.f32.mxu1 %vm4728_vm1, %v4729_v61  ;;  %4562 = vmatprep.mubr.msk.f32.mxu0 %vm4728_vm1, %v4729_v61 }
 0x22c   : > { %v5667_v15 = vadd.f32 %v5580_v55, %v1282_v12 }
 0x22d   : > { %v1286_v54 = vpop.f32.mrb[40].mxu1  ;;  %v1588_v57 = vpop.f32.mrb[98].mxu0 }
 0x22e   : > { %v1287_v16 = vadd.f32 %v1286_v54, %v5459_v47  ;;  %v4140_v29 = vpop.f32.mrb[41].mxu1  ;;  %4468 = vmatmul.mubr.msk.f32.gmra.mrb[146].mxu1 %vm270_vm0, %v5207_v45  ;;  %4563 = vmatmul.mubr.msk.f32.gmra.mrb[204].mxu0 %vm270_vm0, %v2591_v52  ;;  %v4235_v43 = vpop.f32.mrb[99].mxu0  ;;  %v2048_v52 = vld [vmem:[#allocation2 + $0x178] sm:$0xf] }
 0x22f   : > { %4470 = vmatprep.mubr.msk.f32.mxu1 %vm4728_vm1, %v4729_v61  ;;  %4565 = vmatprep.mubr.msk.f32.mxu0 %vm4728_vm1, %v4729_v61 }
 0x230   : > { %v5678_v55 = vadd.f32 %v5593_v33, %v1287_v16 }
 0x231   : > { %v1291_v10 = vpop.f32.mrb[42].mxu1  ;;  %v1593_v0 = vpop.f32.mrb[100].mxu0 }
 0x232   : > { %v1292_v47 = vadd.f32 %v1291_v10, %v5469_v27  ;;  %v4143_v19 = vpop.f32.mrb[43].mxu1  ;;  %4471 = vmatmul.mubr.msk.f32.gmra.mrb[148].mxu1 %vm270_vm0, %v5216_v48  ;;  %4566 = vmatmul.mubr.msk.f32.gmra.mrb[206].mxu0 %vm270_vm0, %v2592_v11  ;;  %v4238_v45 = vpop.f32.mrb[101].mxu0  ;;  %v2865_v10 = vld [vmem:[#allocation2 + $0x15] sm:$0xff] }
 0x233   : > { %4473 = vmatprep.mubr.msk.f32.mxu1 %vm4728_vm1, %v4729_v61 }
 0x234   : > { %v5687_v34 = vadd.f32 %v5606_v3, %v1292_v47 }
 0x235   : > { %v1296_v33 = vpop.f32.mrb[44].mxu1  ;;  %v1598_v4 = vpop.f32.mrb[102].mxu0 }
 0x236   : > { %v1297_v18 = vadd.f32 %v1296_v33, %v5479_v35  ;;  %v4146_v6 = vpop.f32.mrb[45].mxu1  ;;  %4474 = vmatmul.mubr.msk.f32.gmra.mrb[150].mxu1 %vm270_vm0, %v5225_v51  ;;  %v4241_v27 = vpop.f32.mrb[103].mxu0  ;;  %v2866_v33 = vld [vmem:[#allocation2 + $0x1d] sm:$0xff] }
 0x237   : > { %4476 = vmatprep.mubr.msk.f32.mxu1 %vm4728_vm1, %v4729_v61 }
 0x238   : > { %v5695_v48 = vadd.f32 %v5619_v56, %v1297_v18 }
 0x239   : > { %v1301_v38 = vpop.f32.mrb[46].mxu1  ;;  %v1603_v37 = vpop.f32.mrb[104].mxu0 }
 0x23a   : > { %v1302_v3 = vadd.f32 %v1301_v38, %v5441_v13  ;;  %v4149_v25 = vpop.f32.mrb[47].mxu1  ;;  %4477 = vmatmul.mubr.msk.f32.gmra.mrb[152].mxu1 %vm270_vm0, %v5234_v53  ;;  %v4244_v35 = vpop.f32.mrb[105].mxu0 }
 0x23b   : > { %4479 = vmatprep.mubr.msk.f32.mxu1 %vm4728_vm1, %v4729_v61 }
 0x23c   : > { %v5703_v51 = vadd.f32 %v5632_v23, %v1302_v3  ;;  %v2867_v3 = vld [vmem:[#allocation2 + $0x25] sm:$0xff] }
 0x23d   : > { %v1306_v14 = vpop.f32.mrb[48].mxu1  ;;  %v1608_v8 = vpop.f32.mrb[106].mxu0 }
 0x23e   : > { %v1307_v56 = vadd.f32 %v1306_v14, %v5451_v17  ;;  %v4152_v60 = vpop.f32.mrb[49].mxu1  ;;  %4480 = vmatmul.mubr.msk.f32.gmra.mrb[154].mxu1 %vm270_vm0, %v5243_v58  ;;  %v4247_v13 = vpop.f32.mrb[107].mxu0 }
 0x23f   : > { %4482 = vmatprep.mubr.msk.f32.mxu1 %vm4728_vm1, %v4729_v61  ;;  %v2868_v60 = vld [vmem:[#allocation2 + $0x2d] sm:$0xff] }
 0x240   : > { %v5711_v53 = vadd.f32 %v5645_v31, %v1307_v56 }
 0x241   : > { %v1311_v39 = vpop.f32.mrb[50].mxu1  ;;  %v1613_v44 = vpop.f32.mrb[108].mxu0 }
 0x242   : > { %v1312_v23 = vadd.f32 %v1311_v39, %v5461_v24  ;;  %v4155_v46 = vpop.f32.mrb[51].mxu1  ;;  %4483 = vmatmul.mubr.msk.f32.gmra.mrb[156].mxu1 %vm270_vm0, %v5252_v63  ;;  %v4250_v17 = vpop.f32.mrb[109].mxu0 }
 0x243   : > { %4485 = vmatprep.mubr.msk.f32.mxu1 %vm4728_vm1, %v4729_v61  ;;  %v2869_v17 = vld [vmem:[#allocation2 + $0x35] sm:$0xff] }
 0x244   : > { %v5718_v58 = vadd.f32 %v1583_v22, %v1312_v23 }
 0x245   : > { %v1316_v12 = vpop.f32.mrb[52].mxu1  ;;  %v1618_v49 = vpop.f32.mrb[110].mxu0 }
 0x246   : > { %v1317_v41 = vadd.f32 %v1316_v12, %v5471_v30  ;;  %v4158_v31 = vpop.f32.mrb[53].mxu1  ;;  %4486 = vmatmul.mubr.msk.f32.gmra.mrb[158].mxu1 %vm270_vm0, %v5261_v1  ;;  %v4253_v54 = vpop.f32.mrb[111].mxu0 }
 0x247   : > { %4488 = vmatprep.mubr.msk.f32.mxu1 %vm4728_vm1, %v4729_v61 }
 0x248   : > { %v5725_v24 = vadd.f32 %v1588_v57, %v1317_v41 }
 0x249   : > { %v1321_v63 = vpop.f32.mrb[54].mxu1  ;;  %v1623_v16 = vpop.f32.mrb[112].mxu0 }
 0x24a   : > { %v1322_v22 = vadd.f32 %v1321_v63, %v5481_v40  ;;  %v4161_v29 = vpop.f32.mrb[55].mxu1  ;;  %4489 = vmatmul.mubr.msk.f32.gmra.mrb[160].mxu1 %vm270_vm0, %v2048_v52  ;;  %v4256_v43 = vpop.f32.mrb[113].mxu0  ;;  %v2870_v63 = vld [vmem:[#allocation2 + $0x3d] sm:$0xff] }
 0x24b   : > { %4576 = vmatprep.mubr.msk.f32.mxu1 %vm4728_vm1, %v4729_v61 }
 0x24c   : > { %v5731_v30 = vadd.f32 %v1593_v0, %v1322_v22 }
 0x24d   : > { %v1326_v1 = vpop.f32.mrb[56].mxu1  ;;  %v1628_v11 = vpop.f32.mrb[114].mxu0 }
 0x24e   : > { %v1327_v57 = vadd.f32 %v1326_v1, %v5489_v62  ;;  %v4164_v47 = vpop.f32.mrb[57].mxu1  ;;  %4577 = vmatmul.mubr.msk.f32.vlgmr.msra.gmra.mrb[162].mxu1 %vm270_vm0, %v2865_v10  ;;  %v4259_v19 = vpop.f32.mrb[115].mxu0  ;;  %v2871_v1 = vld [vmem:[#allocation2 + $0x45] sm:$0xff] }
 0x24f   : > { %4579 = vmatprep.mubr.msk.f32.mxu1 %vm4728_vm1, %v4729_v61 }
 0x250   : > { %v5737_v40 = vadd.f32 %v1598_v4, %v1327_v57 }
 0x251   : > { %v1331_v45 = vpop.f32.mrb[58].mxu1  ;;  %v5739_v18 = vpop.f32.mrb[116].mxu0 }
 0x252   : > { %v1332_v0 = vadd.f32 %v1331_v45, %v5502_v9  ;;  %v4167_v6 = vpop.f32.mrb[59].mxu1  ;;  %4580 = vmatmul.mubr.msk.f32.gmra.mrb[164].mxu1 %vm270_vm0, %v2866_v33  ;;  %v4347_v27 = vpop.f32.mrb[117].mxu0  ;;  %v2872_v45 = vld [vmem:[#allocation2 + $0x4d] sm:$0xff] }
 0x253   : > { %4582 = vmatprep.mubr.msk.f32.mxu1 %vm4728_vm1, %v4729_v61 }
 0x254   : > { %v5745_v62 = vadd.f32 %v1603_v37, %v1332_v0 }
 0x255   : > { %v1336_v38 = vpop.f32.mrb[60].mxu1  ;;  %v5747_v25 = vpop.f32.mrb[118].mxu0 }
 0x256   : > { %v1337_v4 = vadd.f32 %v1336_v38, %v5512_v28  ;;  %v4170_v35 = vpop.f32.mrb[61].mxu1  ;;  %4583 = vmatmul.mubr.msk.f32.gmra.mrb[166].mxu1 %vm270_vm0, %v2867_v3  ;;  %v4350_v14 = vpop.f32.mrb[119].mxu0  ;;  %v2873_v38 = vld [vmem:[#allocation2 + $0x55] sm:$0xff] }
 0x257   : > { %4585 = vmatprep.mubr.msk.f32.mxu1 %vm4728_vm1, %v4729_v61 }
 0x258   : > { %v5753_v9 = vadd.f32 %v1608_v8, %v1337_v4 }
 0x259   : > { %v1341_v56 = vpop.f32.mrb[62].mxu1  ;;  %v5755_v13 = vpop.f32.mrb[120].mxu0 }
 0x25a   : > { %v1342_v37 = vadd.f32 %v1341_v56, %v5523_v20  ;;  %v4173_v39 = vpop.f32.mrb[63].mxu1  ;;  %4586 = vmatmul.mubr.msk.f32.gmra.mrb[168].mxu1 %vm270_vm0, %v2868_v60  ;;  %v4353_v23 = vpop.f32.mrb[121].mxu0 }
 0x25b   : > { %4588 = vmatprep.mubr.msk.f32.mxu1 %vm4728_vm1, %v4729_v61 }
 0x25c   : > { %v5761_v28 = vadd.f32 %v1613_v44, %v1342_v37  ;;  %v2874_v37 = vld [vmem:[#allocation2 + $0x5d] sm:$0xff] }
 0x25d   : > { %v1346_v46 = vpop.f32.mrb[64].mxu1  ;;  %v5763_v12 = vpop.f32.mrb[122].mxu0 }
 0x25e   : > { %v1347_v8 = vadd.f32 %v1346_v46, %v5534_v59  ;;  %v4176_v41 = vpop.f32.mrb[65].mxu1  ;;  %4589 = vmatmul.mubr.msk.f32.gmra.mrb[170].mxu1 %vm270_vm0, %v2869_v17  ;;  %v4356_v31 = vpop.f32.mrb[123].mxu0 }
 0x25f   : > { %4591 = vmatprep.mubr.msk.f32.mxu1 %vm4728_vm1, %v4729_v61  ;;  %v2875_v31 = vld [vmem:[#allocation2 + $0x65] sm:$0xff] }
 0x260   : > { %v5769_v20 = vadd.f32 %v1618_v49, %v1347_v8 }
 0x261   : > { %v1351_v54 = vpop.f32.mrb[66].mxu1  ;;  %v5771_v52 = vpop.f32.mrb[124].mxu0 }
 0x262   : > { %v1352_v44 = vadd.f32 %v1351_v54, %v5545_v32  ;;  %v4179_v22 = vpop.f32.mrb[67].mxu1  ;;  %4592 = vmatmul.mubr.msk.f32.gmra.mrb[172].mxu1 %vm270_vm0, %v2870_v63  ;;  %v4359_v29 = vpop.f32.mrb[125].mxu0 }
 0x263   : > { %4594 = vmatprep.mubr.msk.f32.mxu1 %vm4728_vm1, %v4729_v61 }
 0x264   : > { %v5777_v59 = vadd.f32 %v1623_v16, %v1352_v44  ;;  %v5790_v16 = vld [vmem:[%s6110_s3] ss:$0 sm:$0xff] }
 0x265   : > { %v1356_v43 = vpop.f32.mrb[68].mxu1  ;;  %v5779_v10 = vpop.f32.mrb[126].mxu0 }
 0x266   : > { %v1357_v49 = vadd.f32 %v1356_v43, %v5556_v50  ;;  %v4182_v57 = vpop.f32.mrb[69].mxu1  ;;  %4595 = vmatmul.mubr.msk.f32.gmra.mrb[174].mxu1 %vm270_vm0, %v2871_v1  ;;  %v4362_v47 = vpop.f32.mrb[127].mxu0  ;;  %v2876_v1 = vld [vmem:[#allocation2 + $0x6d] sm:$0xff] }
 0x267   : > { %4597 = vmatprep.mubr.msk.f32.mxu1 %vm4728_vm1, %v4729_v61 }
 0x268   : > { %v5785_v32 = vadd.f32 %v1628_v11, %v1357_v49 }
 0x269   : > { %v1813_v19 = vpop.f32.mrb[70].mxu1  ;;  %v5792_v33 = vpop.f32.mrb[128].mxu0 }
 0x26a   : > { %v1927_v50 = vadd.f32 %v1813_v19, %v5578_v36  ;;  %v4270_v0 = vpop.f32.mrb[71].mxu1  ;;  %4598 = vmatmul.mubr.msk.f32.gmra.mrb[176].mxu1 %vm270_vm0, %v2872_v45  ;;  %v4365_v6 = vpop.f32.mrb[129].mxu0 }
 0x26b   : > { %4600 = vmatprep.mubr.msk.f32.mxu1 %vm4728_vm1, %v4729_v61  ;;  %v2877_v0 = vld [vmem:[#allocation2 + $0x75] sm:$0xff] }
 0x26c   : > { %v1956_v11 = vadd.f32 %v5790_v16, %v1927_v50 }
 0x26d   : > { %v1818_v27 = vpop.f32.mrb[72].mxu1  ;;  %v5799_v3 = vpop.f32.mrb[130].mxu0 }
 0x26e   : > { %v1979_v4 = vmax.f32 %v1956_v11, 0.0  ;;  %v1928_v35 = vadd.f32 %v1818_v27, %v5591_v7  ;;  %v4273_v14 = vpop.f32.mrb[73].mxu1  ;;  %4601 = vmatmul.mubr.msk.f32.gmra.mrb[178].mxu1 %vm270_vm0, %v2873_v38  ;;  %v4368_v36 = vpop.f32.mrb[131].mxu0 }
 0x26f   : > { %4603 = vmatprep.mubr.msk.f32.mxu1 %vm4728_vm1, %v4729_v61  ;;  %v2878_v14 = vld [vmem:[#allocation2 + $0x7d] sm:$0xff] }
 0x270   : > { %2002 = vst.msk [vmem:[#allocation3] sm:$0xff] %vm270_vm0, %v1979_v4  ;;  %v1957_v56 = vadd.f32 %v5790_v16, %v1928_v35 }
 0x271   : > { %v1823_v60 = vpop.f32.mrb[74].mxu1  ;;  %v5807_v39 = vpop.f32.mrb[132].mxu0 }
 0x272   : > { %v1980_v23 = vmax.f32 %v1957_v56, 0.0  ;;  %v1929_v46 = vadd.f32 %v1823_v60, %v5604_v5  ;;  %v4276_v17 = vpop.f32.mrb[75].mxu1  ;;  %4604 = vmatmul.mubr.msk.f32.gmra.mrb[180].mxu1 %vm270_vm0, %v2874_v37  ;;  %v4371_v7 = vpop.f32.mrb[133].mxu0 }
 0x273   : > { %4606 = vmatprep.mubr.msk.f32.mxu1 %vm4728_vm1, %v4729_v61  ;;  %v2879_v17 = vld [vmem:[#allocation2 + $0x85] sm:$0xff] }
 0x274   : > { %2003 = vst.msk [vmem:[#allocation3 + $0x8] sm:$0xff] %vm270_vm0, %v1980_v23  ;;  %v1958_v8 = vadd.f32 %v5790_v16, %v1929_v46 }
 0x275   : > { %v1828_v41 = vpop.f32.mrb[76].mxu1  ;;  %v5815_v54 = vpop.f32.mrb[134].mxu0 }
 0x276   : > { %v1981_v63 = vmax.f32 %v1958_v8, 0.0  ;;  %v1930_v44 = vadd.f32 %v1828_v41, %v5617_v21  ;;  %v4279_v22 = vpop.f32.mrb[77].mxu1  ;;  %4607 = vmatmul.mubr.msk.f32.gmra.mrb[182].mxu1 %vm270_vm0, %v2875_v31  ;;  %v4374_v5 = vpop.f32.mrb[135].mxu0 }
 0x277   : > { %4609 = vmatprep.mubr.msk.f32.mxu1 %vm4728_vm1, %v4729_v61  ;;  %v2880_v22 = vld [vmem:[#allocation2 + $0x8d] sm:$0xff] }
 0x278   : > { %2004 = vst.msk [vmem:[#allocation3 + $0x10] sm:$0xff] %vm270_vm0, %v1981_v63  ;;  %v1959_v29 = vadd.f32 %v5790_v16, %v1930_v44 }
 0x279   : > { %v1833_v43 = vpop.f32.mrb[78].mxu1  ;;  %v5823_v49 = vpop.f32.mrb[136].mxu0 }
 0x27a   : > { %v1982_v57 = vmax.f32 %v1959_v29, 0.0  ;;  %v1931_v47 = vadd.f32 %v1833_v43, %v5630_v26  ;;  %v4282_v19 = vpop.f32.mrb[79].mxu1  ;;  %4610 = vmatmul.mubr.msk.f32.gmra.mrb[184].mxu1 %vm270_vm0, %v2876_v1  ;;  %v4377_v21 = vpop.f32.mrb[137].mxu0 }
 0x27b   : > { %4612 = vmatprep.mubr.msk.f32.mxu1 %vm4728_vm1, %v4729_v61  ;;  %v2881_v19 = vld [vmem:[#allocation2 + $0x95] sm:$0xff] }
 0x27c   : > { %2005 = vst.msk [vmem:[#allocation3 + $0x18] sm:$0xff] %vm270_vm0, %v1982_v57  ;;  %v1960_v45 = vadd.f32 %v5790_v16, %v1931_v47 }
 0x27d   : > { %v1838_v50 = vpop.f32.mrb[80].mxu1  ;;  %v5831_v6 = vpop.f32.mrb[138].mxu0 }
 0x27e   : > { %v1983_v11 = vmax.f32 %v1960_v45, 0.0  ;;  %v1932_v27 = vadd.f32 %v1838_v50, %v5643_v42  ;;  %v4285_v38 = vpop.f32.mrb[81].mxu1  ;;  %4613 = vmatmul.mubr.msk.f32.gmra.mrb[186].mxu1 %vm270_vm0, %v2877_v0  ;;  %v4380_v26 = vpop.f32.mrb[139].mxu0 }
 0x27f   : > { %4615 = vmatprep.mubr.msk.f32.mxu1 %vm4728_vm1, %v4729_v61  ;;  %v2882_v38 = vld [vmem:[#allocation2 + $0x9d] sm:$0xff] }
 0x280   : > { %2006 = vst.msk [vmem:[#allocation3 + $0x20] sm:$0xff] %vm270_vm0, %v1983_v11  ;;  %v1961_v4 = vadd.f32 %v5790_v16, %v1932_v27 }
 0x281   : > { %v1843_v35 = vpop.f32.mrb[82].mxu1  ;;  %v5839_v36 = vpop.f32.mrb[140].mxu0 }
 0x282   : > { %v1984_v56 = vmax.f32 %v1961_v4, 0.0  ;;  %v1933_v60 = vadd.f32 %v1843_v35, %v5656_v2  ;;  %v4288_v37 = vpop.f32.mrb[83].mxu1  ;;  %4616 = vmatmul.mubr.msk.f32.gmra.mrb[188].mxu1 %vm270_vm0, %v2878_v14  ;;  %v4383_v42 = vpop.f32.mrb[141].mxu0 }
 0x283   : > { %4618 = vmatprep.mubr.msk.f32.mxu1 %vm4728_vm1, %v4729_v61  ;;  %v2883_v37 = vld [vmem:[#allocation2 + $0xa5] sm:$0xff] }
 0x284   : > { %2007 = vst.msk [vmem:[#allocation3 + $0x28] sm:$0xff] %vm270_vm0, %v1984_v56  ;;  %v1962_v23 = vadd.f32 %v5790_v16, %v1933_v60 }
 0x285   : > { %v1848_v46 = vpop.f32.mrb[84].mxu1  ;;  %v5847_v7 = vpop.f32.mrb[142].mxu0 }
 0x286   : > { %v1985_v8 = vmax.f32 %v1962_v23, 0.0  ;;  %v1934_v41 = vadd.f32 %v1848_v46, %v5667_v15  ;;  %v4291_v31 = vpop.f32.mrb[85].mxu1  ;;  %4619 = vmatmul.mubr.msk.f32.gmra.mrb[190].mxu1 %vm270_vm0, %v2879_v17  ;;  %v4386_v2 = vpop.f32.mrb[143].mxu0 }
 0x287   : > { %4621 = vmatprep.mubr.msk.f32.mxu1 %vm4728_vm1, %v4729_v61  ;;  %v2884_v31 = vld [vmem:[#allocation2 + $0xad] sm:$0xff] }
 0x288   : > { %2008 = vst.msk [vmem:[#allocation3 + $0x30] sm:$0xff] %vm270_vm0, %v1985_v8  ;;  %v1963_v63 = vadd.f32 %v5790_v16, %v1934_v41 }
 0x289   : > { %v1853_v44 = vpop.f32.mrb[86].mxu1  ;;  %v5855_v5 = vpop.f32.mrb[144].mxu0 }
 0x28a   : > { %v1986_v29 = vmax.f32 %v1963_v63, 0.0  ;;  %v1935_v43 = vadd.f32 %v1853_v44, %v5678_v55  ;;  %v4294_v1 = vpop.f32.mrb[87].mxu1  ;;  %4622 = vmatmul.mubr.msk.f32.gmra.mrb[192].mxu1 %vm270_vm0, %v2880_v22  ;;  %v4389_v15 = vpop.f32.mrb[145].mxu0 }
 0x28b   : > { %4624 = vmatprep.mubr.msk.f32.mxu1 %vm4728_vm1, %v4729_v61  ;;  %v2885_v1 = vld [vmem:[#allocation2 + $0xb5] sm:$0xff] }
 0x28c   : > { %2009 = vst.msk [vmem:[#allocation3 + $0x38] sm:$0xff] %vm270_vm0, %v1986_v29  ;;  %v1964_v57 = vadd.f32 %v5790_v16, %v1935_v43 }
 0x28d   : > { %v1858_v47 = vpop.f32.mrb[88].mxu1  ;;  %v5863_v21 = vpop.f32.mrb[146].mxu0 }
 0x28e   : > { %v1987_v45 = vmax.f32 %v1964_v57, 0.0  ;;  %v1936_v50 = vadd.f32 %v1858_v47, %v5687_v34  ;;  %v4297_v0 = vpop.f32.mrb[89].mxu1  ;;  %4625 = vmatmul.mubr.msk.f32.gmra.mrb[194].mxu1 %vm270_vm0, %v2881_v19  ;;  %v4392_v55 = vpop.f32.mrb[147].mxu0 }
 0x28f   : > { %4627 = vmatprep.mubr.msk.f32.mxu1 %vm4728_vm1, %v4729_v61  ;;  %v2886_v0 = vld [vmem:[#allocation2 + $0xbd] sm:$0xff] }
 0x290   : > { %2010 = vst.msk [vmem:[#allocation3 + $0x40] sm:$0xff] %vm270_vm0, %v1987_v45  ;;  %v1965_v11 = vadd.f32 %v5790_v16, %v1936_v50 }
 0x291   : > { %v1863_v27 = vpop.f32.mrb[90].mxu1  ;;  %v5871_v26 = vpop.f32.mrb[148].mxu0 }
 0x292   : > { %v1988_v4 = vmax.f32 %v1965_v11, 0.0  ;;  %v1937_v35 = vadd.f32 %v1863_v27, %v5695_v48  ;;  %v4300_v14 = vpop.f32.mrb[91].mxu1  ;;  %4628 = vmatmul.mubr.msk.f32.gmra.mrb[196].mxu1 %vm270_vm0, %v2882_v38  ;;  %v4395_v34 = vpop.f32.mrb[149].mxu0 }
 0x293   : > { %4630 = vmatprep.mubr.msk.f32.mxu1 %vm4728_vm1, %v4729_v61  ;;  %v2887_v14 = vld [vmem:[#allocation2 + $0xc5] sm:$0xf] }
 0x294   : > { %2011 = vst.msk [vmem:[#allocation3 + $0x48] sm:$0xff] %vm270_vm0, %v1988_v4  ;;  %v1966_v56 = vadd.f32 %v5790_v16, %v1937_v35 }
 0x295   : > { %v1868_v60 = vpop.f32.mrb[92].mxu1  ;;  %v5879_v42 = vpop.f32.mrb[150].mxu0 }
 0x296   : > { %v1989_v23 = vmax.f32 %v1966_v56, 0.0  ;;  %v1938_v46 = vadd.f32 %v1868_v60, %v5703_v51  ;;  %v4303_v17 = vpop.f32.mrb[93].mxu1  ;;  %4631 = vmatmul.mubr.msk.f32.gmra.mrb[198].mxu1 %vm270_vm0, %v2883_v37  ;;  %v4398_v48 = vpop.f32.mrb[151].mxu0 }
 0x297   : > { %4633 = vmatprep.mubr.msk.f32.mxu1 %vm4728_vm1, %v4729_v61 }
 0x298   : > { %2012 = vst.msk [vmem:[#allocation3 + $0x50] sm:$0xff] %vm270_vm0, %v1989_v23  ;;  %v1967_v8 = vadd.f32 %v5790_v16, %v1938_v46 }
 0x299   : > { %v1873_v41 = vpop.f32.mrb[94].mxu1  ;;  %v5887_v2 = vpop.f32.mrb[152].mxu0 }
 0x29a   : > { %v1990_v63 = vmax.f32 %v1967_v8, 0.0  ;;  %v1939_v44 = vadd.f32 %v1873_v41, %v5711_v53  ;;  %v4306_v22 = vpop.f32.mrb[95].mxu1  ;;  %4634 = vmatmul.mubr.msk.f32.gmra.mrb[200].mxu1 %vm270_vm0, %v2884_v31  ;;  %v4401_v51 = vpop.f32.mrb[153].mxu0 }
 0x29b   : > { %4636 = vmatprep.mubr.msk.f32.mxu1 %vm4728_vm1, %v4729_v61 }
 0x29c   : > { %2013 = vst.msk [vmem:[#allocation3 + $0x58] sm:$0xff] %vm270_vm0, %v1990_v63  ;;  %v1968_v29 = vadd.f32 %v5790_v16, %v1939_v44 }
 0x29d   : > { %v1878_v43 = vpop.f32.mrb[96].mxu1  ;;  %v5895_v15 = vpop.f32.mrb[154].mxu0 }
 0x29e   : > { %v1991_v57 = vmax.f32 %v1968_v29, 0.0  ;;  %v1940_v47 = vadd.f32 %v1878_v43, %v5718_v58  ;;  %v4309_v19 = vpop.f32.mrb[97].mxu1  ;;  %4637 = vmatmul.mubr.msk.f32.gmra.mrb[202].mxu1 %vm270_vm0, %v2885_v1  ;;  %v4404_v53 = vpop.f32.mrb[155].mxu0 }
 0x29f   : > { %4639 = vmatprep.mubr.msk.f32.mxu1 %vm4728_vm1, %v4729_v61 }
 0x2a0   : > { %2014 = vst.msk [vmem:[#allocation3 + $0x60] sm:$0xff] %vm270_vm0, %v1991_v57  ;;  %v1969_v45 = vadd.f32 %v5790_v16, %v1940_v47 }
 0x2a1   : > { %v1883_v50 = vpop.f32.mrb[98].mxu1  ;;  %v5903_v55 = vpop.f32.mrb[156].mxu0 }
 0x2a2   : > { %v1992_v11 = vmax.f32 %v1969_v45, 0.0  ;;  %v1941_v27 = vadd.f32 %v1883_v50, %v5725_v24  ;;  %v4312_v38 = vpop.f32.mrb[99].mxu1  ;;  %4640 = vmatmul.mubr.msk.f32.gmra.mrb[204].mxu1 %vm270_vm0, %v2886_v0  ;;  %v4407_v58 = vpop.f32.mrb[157].mxu0 }
 0x2a3   : > { %4642 = vmatprep.mubr.msk.f32.mxu1 %vm4728_vm1, %v4729_v61 }
 0x2a4   : > { %2015 = vst.msk [vmem:[#allocation3 + $0x68] sm:$0xff] %vm270_vm0, %v1992_v11  ;;  %v1970_v4 = vadd.f32 %v5790_v16, %v1941_v27 }
 0x2a5   : > { %v1888_v35 = vpop.f32.mrb[100].mxu1  ;;  %v5911_v34 = vpop.f32.mrb[158].mxu0 }
 0x2a6   : > { %v1993_v56 = vmax.f32 %v1970_v4, 0.0  ;;  %v1942_v60 = vadd.f32 %v1888_v35, %v5731_v30  ;;  %v4315_v37 = vpop.f32.mrb[101].mxu1  ;;  %4643 = vmatmul.mubr.msk.f32.gmra.mrb[206].mxu1 %vm270_vm0, %v2887_v14  ;;  %v4410_v24 = vpop.f32.mrb[159].mxu0 }
 0x2a8   : > { %2016 = vst.msk [vmem:[#allocation3 + $0x70] sm:$0xff] %vm270_vm0, %v1993_v56  ;;  %v1971_v23 = vadd.f32 %v5790_v16, %v1942_v60 }
 0x2a9   : > { %v1893_v61 = vpop.f32.mrb[102].mxu1  ;;  %v5917_v46 = vpop.f32.mrb[160].mxu0 }
 0x2aa   : > { %v1994_v17 = vmax.f32 %v1971_v23, 0.0  ;;  %v1943_v48 = vadd.f32 %v1893_v61, %v5737_v40  ;;  %v4318_v8 = vpop.f32.mrb[103].mxu1  ;;  %v4413_v41 = vpop.f32.mrb[161].mxu0 }
 0x2ac   : > { %2017 = vst.msk [vmem:[#allocation3 + $0x78] sm:$0xff] %vm270_vm0, %v1994_v17  ;;  %v1972_v30 = vadd.f32 %v5790_v16, %v1943_v48 }
 0x2ad   : > { %v1898_v31 = vpop.f32.mrb[104].mxu1  ;;  %v2728_v63 = vpop.f32.mrb[162].mxu0 }
 0x2ae   : > { %v1995_v44 = vmax.f32 %v1972_v30, 0.0  ;;  %v1944_v22 = vadd.f32 %v1898_v31, %v5745_v62  ;;  %v4321_v51 = vpop.f32.mrb[105].mxu1  ;;  %v4501_v29 = vpop.f32.mrb[163].mxu0 }
 0x2b0   : > { %2018 = vst.msk [vmem:[#allocation3 + $0x80] sm:$0xff] %vm270_vm0, %v1995_v44  ;;  %v1973_v43 = vadd.f32 %v5790_v16, %v1944_v22 }
 0x2b1   : > { %v1903_v1 = vpop.f32.mrb[106].mxu1  ;;  %v2733_v57 = vpop.f32.mrb[164].mxu0 }
 0x2b2   : > { %v1996_v40 = vmax.f32 %v1973_v43, 0.0  ;;  %v1945_v47 = vadd.f32 %v1903_v1, %v5753_v9  ;;  %v4324_v19 = vpop.f32.mrb[107].mxu1  ;;  %v4504_v53 = vpop.f32.mrb[165].mxu0 }
 0x2b4   : > { %2019 = vst.msk [vmem:[#allocation3 + $0x88] sm:$0xff] %vm270_vm0, %v1996_v40  ;;  %v1974_v45 = vadd.f32 %v5790_v16, %v1945_v47 }
 0x2b5   : > { %v1908_v50 = vpop.f32.mrb[108].mxu1  ;;  %v2738_v0 = vpop.f32.mrb[166].mxu0 }
 0x2b6   : > { %v1997_v62 = vmax.f32 %v1974_v45, 0.0  ;;  %v1946_v11 = vadd.f32 %v1908_v50, %v5761_v28  ;;  %v4327_v27 = vpop.f32.mrb[109].mxu1  ;;  %v4507_v38 = vpop.f32.mrb[167].mxu0 }
 0x2b8   : > { %2020 = vst.msk [vmem:[#allocation3 + $0x90] sm:$0xff] %vm270_vm0, %v1997_v62  ;;  %v1975_v58 = vadd.f32 %v5790_v16, %v1946_v11 }
 0x2b9   : > { %v1913_v4 = vpop.f32.mrb[110].mxu1  ;;  %v2743_v35 = vpop.f32.mrb[168].mxu0 }
 0x2ba   : > { %v1998_v9 = vmax.f32 %v1975_v58, 0.0  ;;  %v1947_v14 = vadd.f32 %v1913_v4, %v5769_v20  ;;  %v4330_v56 = vpop.f32.mrb[111].mxu1  ;;  %v4510_v60 = vpop.f32.mrb[169].mxu0 }
 0x2bc   : > { %2021 = vst.msk [vmem:[#allocation3 + $0x98] sm:$0xff] %vm270_vm0, %v1998_v9  ;;  %v1976_v37 = vadd.f32 %v5790_v16, %v1947_v14 }
 0x2bd   : > { %v1918_v24 = vpop.f32.mrb[112].mxu1  ;;  %v2748_v23 = vpop.f32.mrb[170].mxu0 }
 0x2be   : > { %v1999_v28 = vmax.f32 %v1976_v37, 0.0  ;;  %v1948_v61 = vadd.f32 %v1918_v24, %v5777_v59  ;;  %v4333_v17 = vpop.f32.mrb[113].mxu1  ;;  %v4513_v48 = vpop.f32.mrb[171].mxu0 }
 0x2c0   : > { %2022 = vst.msk [vmem:[#allocation3 + $0xa0] sm:$0xff] %vm270_vm0, %v1999_v28  ;;  %v1977_v8 = vadd.f32 %v5790_v16, %v1948_v61 }
 0x2c1   : > { %v1923_v41 = vpop.f32.mrb[114].mxu1  ;;  %v2753_v30 = vpop.f32.mrb[172].mxu0 }
 0x2c2   : > { %v2000_v20 = vmax.f32 %v1977_v8, 0.0  ;;  %v1949_v31 = vadd.f32 %v1923_v41, %v5785_v32  ;;  %v4336_v44 = vpop.f32.mrb[115].mxu1  ;;  %v4516_v22 = vpop.f32.mrb[173].mxu0 }
 0x2c4   : > { %2023 = vst.msk [vmem:[#allocation3 + $0xa8] sm:$0xff] %vm270_vm0, %v2000_v20  ;;  %v1978_v51 = vadd.f32 %v5790_v16, %v1949_v31 }
 0x2c5   : > { %v2456_v29 = vpop.f32.mrb[116].mxu1  ;;  %v2758_v59 = vpop.f32.mrb[174].mxu0 }
 0x2c6   : > { %v2001_v43 = vmax.f32 %v1978_v51, 0.0  ;;  %v2457_v1 = vadd.f32 %v2456_v29, %v5739_v18  ;;  %v4424_v40 = vpop.f32.mrb[117].mxu1  ;;  %v4519_v47 = vpop.f32.mrb[175].mxu0 }
 0x2c8   : > { %2025 = vst.msk [vmem:[#allocation3 + $0xb0] sm:$0xf] %vm2024_vm2, %v2001_v43  ;;  %v5942_v19 = vadd.f32 %v2728_v63, %v2457_v1 }
 0x2c9   : > { %v2461_v53 = vpop.f32.mrb[118].mxu1  ;;  %v2763_v32 = vpop.f32.mrb[176].mxu0 }
 0x2ca   : > { %v2462_v45 = vadd.f32 %v2461_v53, %v5747_v25  ;;  %v4427_v50 = vpop.f32.mrb[119].mxu1  ;;  %v4522_v62 = vpop.f32.mrb[177].mxu0 }
 0x2cc   : > { %v5945_v11 = vadd.f32 %v2733_v57, %v2462_v45 }
 0x2cd   : > { %v2466_v27 = vpop.f32.mrb[120].mxu1  ;;  %v2768_v38 = vpop.f32.mrb[178].mxu0 }
 0x2ce   : > { %v2467_v58 = vadd.f32 %v2466_v27, %v5755_v13  ;;  %v4430_v4 = vpop.f32.mrb[121].mxu1  ;;  %v4525_v18 = vpop.f32.mrb[179].mxu0 }
 0x2d0   : > { %v5948_v9 = vadd.f32 %v2738_v0, %v2467_v58 }
 0x2d1   : > { %v2471_v14 = vpop.f32.mrb[122].mxu1  ;;  %v2773_v56 = vpop.f32.mrb[180].mxu0 }
 0x2d2   : > { %v2472_v63 = vadd.f32 %v2471_v14, %v5763_v12  ;;  %v4433_v60 = vpop.f32.mrb[123].mxu1  ;;  %v4528_v37 = vpop.f32.mrb[181].mxu0 }
 0x2d4   : > { %v5951_v24 = vadd.f32 %v2743_v35, %v2472_v63 }
 0x2d5   : > { %v2476_v25 = vpop.f32.mrb[124].mxu1  ;;  %v2778_v28 = vpop.f32.mrb[182].mxu0 }
 0x2d6   : > { %v2477_v57 = vadd.f32 %v2476_v25, %v5771_v52  ;;  %v4436_v61 = vpop.f32.mrb[125].mxu1  ;;  %v4531_v17 = vpop.f32.mrb[183].mxu0 }
 0x2d8   : > { %v5954_v48 = vadd.f32 %v2748_v23, %v2477_v57 }
 0x2d9   : > { %v2481_v13 = vpop.f32.mrb[126].mxu1  ;;  %v2783_v8 = vpop.f32.mrb[184].mxu0 }
 0x2da   : > { %v2482_v0 = vadd.f32 %v2481_v13, %v5779_v10  ;;  %v4439_v41 = vpop.f32.mrb[127].mxu1  ;;  %v4534_v20 = vpop.f32.mrb[185].mxu0 }
 0x2dc   : > { %v5957_v31 = vadd.f32 %v2753_v30, %v2482_v0 }
 0x2dd   : > { %v2486_v12 = vpop.f32.mrb[128].mxu1  ;;  %v2788_v44 = vpop.f32.mrb[186].mxu0 }
 0x2de   : > { %v2487_v35 = vadd.f32 %v2486_v12, %v5792_v33  ;;  %v4442_v22 = vpop.f32.mrb[129].mxu1  ;;  %v4537_v51 = vpop.f32.mrb[187].mxu0 }
 0x2e0   : > { %v5960_v29 = vadd.f32 %v2758_v59, %v2487_v35 }
 0x2e1   : > { %v2491_v52 = vpop.f32.mrb[130].mxu1  ;;  %v2793_v43 = vpop.f32.mrb[188].mxu0 }
 0x2e2   : > { %v2492_v23 = vadd.f32 %v2491_v52, %v5799_v3  ;;  %v4445_v1 = vpop.f32.mrb[131].mxu1  ;;  %v4540_v40 = vpop.f32.mrb[189].mxu0 }
 0x2e4   : > { %v5963_v47 = vadd.f32 %v2763_v32, %v2492_v23 }
 0x2e5   : > { %v2496_v10 = vpop.f32.mrb[132].mxu1  ;;  %v2798_v53 = vpop.f32.mrb[190].mxu0 }
 0x2e6   : > { %v2497_v30 = vadd.f32 %v2496_v10, %v5807_v39  ;;  %v4448_v45 = vpop.f32.mrb[133].mxu1  ;;  %v4543_v50 = vpop.f32.mrb[191].mxu0 }
 0x2e8   : > { %v5966_v62 = vadd.f32 %v2768_v38, %v2497_v30 }
 0x2e9   : > { %v2501_v33 = vpop.f32.mrb[134].mxu1  ;;  %v2803_v27 = vpop.f32.mrb[192].mxu0 }
 0x2ea   : > { %v2502_v59 = vadd.f32 %v2501_v33, %v5815_v54  ;;  %v4451_v58 = vpop.f32.mrb[135].mxu1  ;;  %v4546_v4 = vpop.f32.mrb[193].mxu0 }
 0x2ec   : > { %v5969_v18 = vadd.f32 %v2773_v56, %v2502_v59 }
 0x2ed   : > { %v2506_v3 = vpop.f32.mrb[136].mxu1  ;;  %v2808_v14 = vpop.f32.mrb[194].mxu0 }
 0x2ee   : > { %v2507_v32 = vadd.f32 %v2506_v3, %v5823_v49  ;;  %v4454_v63 = vpop.f32.mrb[137].mxu1  ;;  %v4549_v60 = vpop.f32.mrb[195].mxu0 }
 0x2f0   : > { %v5972_v37 = vadd.f32 %v2778_v28, %v2507_v32 }
 0x2f1   : > { %v2511_v39 = vpop.f32.mrb[138].mxu1  ;;  %v2813_v25 = vpop.f32.mrb[196].mxu0 }
 0x2f2   : > { %v2512_v38 = vadd.f32 %v2511_v39, %v5831_v6  ;;  %v4457_v57 = vpop.f32.mrb[139].mxu1  ;;  %v4552_v61 = vpop.f32.mrb[197].mxu0 }
 0x2f4   : > { %v5975_v17 = vadd.f32 %v2783_v8, %v2512_v38 }
 0x2f5   : > { %v2516_v54 = vpop.f32.mrb[140].mxu1  ;;  %v2818_v13 = vpop.f32.mrb[198].mxu0 }
 0x2f6   : > { %v2517_v56 = vadd.f32 %v2516_v54, %v5839_v36  ;;  %v4460_v0 = vpop.f32.mrb[141].mxu1  ;;  %v4555_v41 = vpop.f32.mrb[199].mxu0 }
 0x2f8   : > { %v5978_v20 = vadd.f32 %v2788_v44, %v2517_v56 }
 0x2f9   : > { %v2521_v49 = vpop.f32.mrb[142].mxu1  ;;  %v2823_v12 = vpop.f32.mrb[200].mxu0 }
 0x2fa   : > { %v2522_v28 = vadd.f32 %v2521_v49, %v5847_v7  ;;  %v4463_v35 = vpop.f32.mrb[143].mxu1  ;;  %v4558_v22 = vpop.f32.mrb[201].mxu0 }
 0x2fc   : > { %v5981_v51 = vadd.f32 %v2793_v43, %v2522_v28 }
 0x2fd   : > { %v2526_v6 = vpop.f32.mrb[144].mxu1  ;;  %v2828_v52 = vpop.f32.mrb[202].mxu0 }
 0x2fe   : > { %v2527_v8 = vadd.f32 %v2526_v6, %v5855_v5  ;;  %v4466_v23 = vpop.f32.mrb[145].mxu1  ;;  %v4561_v1 = vpop.f32.mrb[203].mxu0 }
 0x300   : > { %v5984_v40 = vadd.f32 %v2798_v53, %v2527_v8 }
 0x301   : > { %v2531_v36 = vpop.f32.mrb[146].mxu1  ;;  %v2833_v10 = vpop.f32.mrb[204].mxu0 }
 0x302   : > { %v2532_v44 = vadd.f32 %v2531_v36, %v5863_v21  ;;  %v4469_v30 = vpop.f32.mrb[147].mxu1  ;;  %v4564_v45 = vpop.f32.mrb[205].mxu0 }
 0x304   : > { %v5987_v50 = vadd.f32 %v2803_v27, %v2532_v44 }
 0x305   : > { %v2536_v7 = vpop.f32.mrb[148].mxu1  ;;  %v2838_v33 = vpop.f32.mrb[206].mxu0 }
 0x306   : > { %v2537_v43 = vadd.f32 %v2536_v7, %v5871_v26  ;;  %v4472_v59 = vpop.f32.mrb[149].mxu1  ;;  %v4567_v58 = vpop.f32.mrb[207].mxu0  ;;  %v3229_v7 = vld [vmem:[#allocation3] ss:$2 sm:$0xff] }
 0x308   : > { %v5990_v4 = vadd.f32 %v2808_v14, %v2537_v43 }
 0x309   : > { %v2541_v5 = vpop.f32.mrb[150].mxu1 }
 0x30a   : > { %v2542_v53 = vadd.f32 %v2541_v5, %v5879_v42  ;;  %v4475_v3 = vpop.f32.mrb[151].mxu1 }
 0x30c   : > { %v5993_v32 = vadd.f32 %v2813_v25, %v2542_v53 }
 0x30d   : > { %v2546_v63 = vpop.f32.mrb[152].mxu1 }
 0x30e   : > { %v2547_v21 = vadd.f32 %v2546_v63, %v5887_v2  ;;  %v4478_v60 = vpop.f32.mrb[153].mxu1 }
 0x310   : > { %v5996_v27 = vadd.f32 %v2818_v13, %v2547_v21 }
 0x311   : > { %v2551_v39 = vpop.f32.mrb[154].mxu1 }
 0x312   : > { %v2552_v38 = vadd.f32 %v2551_v39, %v5895_v15  ;;  %v4481_v26 = vpop.f32.mrb[155].mxu1 }
 0x314   : > { %v5999_v57 = vadd.f32 %v2823_v12, %v2552_v38 }
 0x315   : > { %v2556_v14 = vpop.f32.mrb[156].mxu1 }
 0x316   : > { %v2557_v61 = vadd.f32 %v2556_v14, %v5903_v55  ;;  %v4484_v54 = vpop.f32.mrb[157].mxu1  ;;  %v3231_v14 = vld [vmem:[#allocation3 + $0x10] ss:$2 sm:$0xff] }
 0x318   : > { %v6002_v42 = vadd.f32 %v2828_v52, %v2557_v61  ;;  %v3255_v61 = vld [vmem:[#allocation3 + $0x11] ss:$2 sm:$0xff] }
 0x319   : > { %v2561_v25 = vpop.f32.mrb[158].mxu1 }
 0x31a   : > { %v2562_v56 = vadd.f32 %v2561_v25, %v5911_v34  ;;  %v4487_v0 = vpop.f32.mrb[159].mxu1 }
 0x31c   : > { %v6005_v2 = vadd.f32 %v2833_v10, %v2562_v56 }
 0x31d   : > { %v2566_v13 = vpop.f32.mrb[160].mxu1 }
 0x31e   : > { %v2567_v41 = vadd.f32 %v2566_v13, %v5917_v46  ;;  %v4490_v49 = vpop.f32.mrb[161].mxu1 }
 0x31f   : > { %v3277_v49 = vmax.f32 %v3231_v14, %v3255_v61  ;;  %v3237_v14 = vld [vmem:[#allocation3 + $0x40] ss:$2 sm:$0xff]  ;;  %v3261_v61 = vld [vmem:[#allocation3 + $0x41] ss:$2 sm:$0xff] }
 0x320   : > { %v6008_v15 = vadd.f32 %v2838_v33, %v2567_v41  ;;  %v3253_v33 = vld [vmem:[#allocation3 + $0x1] ss:$2 sm:$0xff] }
 0x321   : > { %v3023_v12 = vpop.f32.mrb[162].mxu1  ;;  %v3276_v3 = vmax.f32 %v3229_v7, %v3253_v33 }
 0x322   : > { %v3137_v28 = vadd.f32 %v3023_v12, %v5942_v19  ;;  %v4578_v35 = vpop.f32.mrb[163].mxu1 }
 0x324   : > { %v3160_v55 = vadd.f32 %v5790_v16, %v3137_v28 }
 0x325   : > { %v3028_v22 = vpop.f32.mrb[164].mxu1 }
 0x326   : > { %v3183_v6 = vmax.f32 %v3160_v55, 0.0  ;;  %v3138_v52 = vadd.f32 %v3028_v22, %v5945_v11  ;;  %v4581_v34 = vpop.f32.mrb[165].mxu1 }
 0x327   : > { %v3257_v34 = vld [vmem:[#allocation3 + $0x21] ss:$2 sm:$0xff] }
 0x328   : > { %3206 = vst.msk [vmem:[#allocation4] sm:$0xff] %vm270_vm0, %v3183_v6  ;;  %v3161_v8 = vadd.f32 %v5790_v16, %v3138_v52  ;;  %v3233_v52 = vld [vmem:[#allocation3 + $0x20] ss:$2 sm:$0xff] }
 0x329   : > { %v3033_v46 = vpop.f32.mrb[166].mxu1 }
 0x32a   : > { %v3184_v23 = vmax.f32 %v3161_v8, 0.0  ;;  %v3139_v1 = vadd.f32 %v3033_v46, %v5948_v9  ;;  %v4584_v36 = vpop.f32.mrb[167].mxu1 }
 0x32c   : > { %3207 = vst.msk [vmem:[#allocation4 + $0x8] sm:$0xff] %vm270_vm0, %v3184_v23  ;;  %v3162_v19 = vadd.f32 %v5790_v16, %v3139_v1 }
 0x32d   : > { %v3038_v10 = vpop.f32.mrb[168].mxu1 }
 0x32e   : > { %v3185_v44 = vmax.f32 %v3162_v19, 0.0  ;;  %v3140_v30 = vadd.f32 %v3038_v10, %v5951_v24  ;;  %v4587_v11 = vpop.f32.mrb[169].mxu1  ;;  %v3278_v10 = vmax.f32 %v3233_v52, %v3257_v34 }
 0x330   : > { %3208 = vst.msk [vmem:[#allocation4 + $0x10] sm:$0xff] %vm270_vm0, %v3185_v44  ;;  %v3163_v45 = vadd.f32 %v5790_v16, %v3140_v30 }
 0x331   : > { %v3043_v43 = vpop.f32.mrb[170].mxu1 }
 0x332   : > { %v3186_v59 = vmax.f32 %v3163_v45, 0.0  ;;  %v3141_v9 = vadd.f32 %v3043_v43, %v5954_v48  ;;  %v4590_v58 = vpop.f32.mrb[171].mxu1  ;;  %v3235_v43 = vld [vmem:[#allocation3 + $0x30] ss:$2 sm:$0xff] }
 0x333   : > { %v3288_v5 = vld [vmem:[#allocation4] ss:$2 sm:$0xff]  ;;  %v3312_v53 = vld [vmem:[#allocation4 + $0x1] ss:$2 sm:$0xff] }
 0x334   : > { %v3335_v63 = vmax.f32 %v3288_v5, %v3312_v53  ;;  %3209 = vst.msk [vmem:[#allocation4 + $0x18] sm:$0xff] %vm270_vm0, %v3186_v59  ;;  %v3164_v24 = vadd.f32 %v5790_v16, %v3141_v9  ;;  %v3259_v59 = vld [vmem:[#allocation3 + $0x31] ss:$2 sm:$0xff] }
 0x335   : > { %v3048_v21 = vpop.f32.mrb[172].mxu1 }
 0x336   : > { %v3347_v60 = vmax.f32 %v3276_v3, %v3335_v63  ;;  %v3187_v39 = vmax.f32 %v3164_v24, 0.0  ;;  %v3142_v48 = vadd.f32 %v3048_v21, %v5957_v31  ;;  %v4593_v38 = vpop.f32.mrb[173].mxu1  ;;  %v3279_v24 = vmax.f32 %v3235_v43, %v3259_v59 }
 0x338   : > { %3359 = vst.msk [vmem:[%s6028_s18] sm:$0xff] %vm270_vm0, %v3347_v60  ;;  %3210 = vst.msk [vmem:[#allocation4 + $0x20] sm:$0xff] %vm270_vm0, %v3187_v39  ;;  %v3165_v26 = vadd.f32 %v5790_v16, %v3142_v48 }
 0x339   : > { %v3053_v54 = vpop.f32.mrb[174].mxu1 }
 0x33a   : > { %v3188_v25 = vmax.f32 %v3165_v26, 0.0  ;;  %v3143_v56 = vadd.f32 %v3053_v54, %v5960_v29  ;;  %v4596_v0 = vpop.f32.mrb[175].mxu1 }
 0x33b   : > { %v3290_v13 = vld [vmem:[#allocation4 + $0x10] ss:$2 sm:$0xff]  ;;  %v3314_v41 = vld [vmem:[#allocation4 + $0x11] ss:$2 sm:$0xff] }
 0x33c   : > { %v3336_v12 = vmax.f32 %v3290_v13, %v3314_v41  ;;  %3211 = vst.msk [vmem:[#allocation4 + $0x28] sm:$0xff] %vm270_vm0, %v3188_v25  ;;  %v3166_v31 = vadd.f32 %v5790_v16, %v3143_v56 }
 0x33d   : > { %v3058_v28 = vpop.f32.mrb[176].mxu1 }
 0x33e   : > { %v3348_v35 = vmax.f32 %v3277_v49, %v3336_v12  ;;  %v3189_v55 = vmax.f32 %v3166_v31, 0.0  ;;  %v3144_v22 = vadd.f32 %v3058_v28, %v5963_v47  ;;  %v4599_v6 = vpop.f32.mrb[177].mxu1  ;;  %v3280_v49 = vmax.f32 %v3237_v14, %v3261_v61 }
 0x33f   : > { %v3239_v6 = vld [vmem:[#allocation3 + $0x50] ss:$2 sm:$0xff] }
 0x340   : > { %3360 = vst.msk [vmem:[%s6028_s18 + $0x8] sm:$0xff] %vm270_vm0, %v3348_v35  ;;  %3212 = vst.msk [vmem:[#allocation4 + $0x30] sm:$0xff] %vm270_vm0, %v3189_v55  ;;  %v3167_v29 = vadd.f32 %v5790_v16, %v3144_v22 }
 0x341   : > { %v3063_v8 = vpop.f32.mrb[178].mxu1 }
 0x342   : > { %v3190_v46 = vmax.f32 %v3167_v29, 0.0  ;;  %v3145_v23 = vadd.f32 %v3063_v8, %v5966_v62  ;;  %v4602_v1 = vpop.f32.mrb[179].mxu1  ;;  %v3263_v29 = vld [vmem:[#allocation3 + $0x51] ss:$2 sm:$0xff] }
 0x343   : > { %v3292_v36 = vld [vmem:[#allocation4 + $0x20] ss:$2 sm:$0xff]  ;;  %v3316_v19 = vld [vmem:[#allocation4 + $0x21] ss:$2 sm:$0xff] }
 0x344   : > { %v3337_v44 = vmax.f32 %v3292_v36, %v3316_v19  ;;  %3213 = vst.msk [vmem:[#allocation4 + $0x38] sm:$0xff] %vm270_vm0, %v3190_v46  ;;  %v3168_v47 = vadd.f32 %v5790_v16, %v3145_v23  ;;  %v3281_v36 = vmax.f32 %v3239_v6, %v3263_v29 }
 0x345   : > { %v3068_v30 = vpop.f32.mrb[180].mxu1 }
 0x346   : > { %v3349_v11 = vmax.f32 %v3278_v10, %v3337_v44  ;;  %v3191_v45 = vmax.f32 %v3168_v47, 0.0  ;;  %v3146_v7 = vadd.f32 %v3068_v30, %v5969_v18  ;;  %v4605_v33 = vpop.f32.mrb[181].mxu1 }
 0x348   : > { %3361 = vst.msk [vmem:[%s6028_s18 + $0x10] sm:$0xff] %vm270_vm0, %v3349_v11  ;;  %3214 = vst.msk [vmem:[#allocation4 + $0x40] sm:$0xff] %vm270_vm0, %v3191_v45  ;;  %v3169_v62 = vadd.f32 %v5790_v16, %v3146_v7  ;;  %v3241_v45 = vld [vmem:[#allocation3 + $0x60] ss:$2 sm:$0xff]  ;;  %v3265_v7 = vld [vmem:[#allocation3 + $0x61] ss:$2 sm:$0xff] }
 0x349   : > { %v3073_v9 = vpop.f32.mrb[182].mxu1 }
 0x34a   : > { %v3192_v58 = vmax.f32 %v3169_v62, 0.0  ;;  %v3147_v5 = vadd.f32 %v3073_v9, %v5972_v37  ;;  %v4608_v53 = vpop.f32.mrb[183].mxu1 }
 0x34b   : > { %v3294_v3 = vld [vmem:[#allocation4 + $0x30] ss:$2 sm:$0xff]  ;;  %v3318_v63 = vld [vmem:[#allocation4 + $0x31] ss:$2 sm:$0xff] }
 0x34c   : > { %v3338_v21 = vmax.f32 %v3294_v3, %v3318_v63  ;;  %3215 = vst.msk [vmem:[#allocation4 + $0x48] sm:$0xff] %vm270_vm0, %v3192_v58  ;;  %v3170_v18 = vadd.f32 %v5790_v16, %v3147_v5  ;;  %v3282_v5 = vmax.f32 %v3241_v45, %v3265_v7 }
 0x34d   : > { %v3078_v60 = vpop.f32.mrb[184].mxu1 }
 0x34e   : > { %v3350_v39 = vmax.f32 %v3279_v24, %v3338_v21  ;;  %v3193_v48 = vmax.f32 %v3170_v18, 0.0  ;;  %v3148_v38 = vadd.f32 %v3078_v60, %v5975_v17  ;;  %v4611_v26 = vpop.f32.mrb[185].mxu1  ;;  %v3243_v60 = vld [vmem:[#allocation3 + $0x70] ss:$2 sm:$0xff] }
 0x350   : > { %3362 = vst.msk [vmem:[%s6028_s18 + $0x18] sm:$0xff] %vm270_vm0, %v3350_v39  ;;  %3216 = vst.msk [vmem:[#allocation4 + $0x50] sm:$0xff] %vm270_vm0, %v3193_v48  ;;  %v3171_v37 = vadd.f32 %v5790_v16, %v3148_v38  ;;  %v3267_v39 = vld [vmem:[#allocation3 + $0x71] ss:$2 sm:$0xff] }
 0x351   : > { %v3083_v54 = vpop.f32.mrb[186].mxu1 }
 0x352   : > { %v3194_v25 = vmax.f32 %v3171_v37, 0.0  ;;  %v3149_v56 = vadd.f32 %v3083_v54, %v5978_v20  ;;  %v4614_v0 = vpop.f32.mrb[187].mxu1  ;;  %v3283_v54 = vmax.f32 %v3243_v60, %v3267_v39 }
 0x353   : > { %v3296_v13 = vld [vmem:[#allocation4 + $0x40] ss:$2 sm:$0xff]  ;;  %v3320_v41 = vld [vmem:[#allocation4 + $0x41] ss:$2 sm:$0xff] }
 0x354   : > { %v3339_v12 = vmax.f32 %v3296_v13, %v3320_v41  ;;  %3217 = vst.msk [vmem:[#allocation4 + $0x58] sm:$0xff] %vm270_vm0, %v3194_v25  ;;  %v3172_v17 = vadd.f32 %v5790_v16, %v3149_v56 }
 0x355   : > { %v3088_v31 = vpop.f32.mrb[188].mxu1 }
 0x356   : > { %v3351_v28 = vmax.f32 %v3280_v49, %v3339_v12  ;;  %v3195_v35 = vmax.f32 %v3172_v17, 0.0  ;;  %v3150_v55 = vadd.f32 %v3088_v31, %v5981_v51  ;;  %v4617_v22 = vpop.f32.mrb[189].mxu1  ;;  %v3269_v17 = vld [vmem:[#allocation3 + $0x81] ss:$2 sm:$0xff] }
 0x358   : > { %3363 = vst.msk [vmem:[%s6028_s18 + $0x20] sm:$0xff] %vm270_vm0, %v3351_v28  ;;  %3218 = vst.msk [vmem:[#allocation4 + $0x60] sm:$0xff] %vm270_vm0, %v3195_v35  ;;  %v3173_v20 = vadd.f32 %v5790_v16, %v3150_v55 }
 0x359   : > { %v3093_v52 = vpop.f32.mrb[190].mxu1 }
 0x35a   : > { %v3196_v34 = vmax.f32 %v3173_v20, 0.0  ;;  %v3151_v8 = vadd.f32 %v3093_v52, %v5984_v40  ;;  %v4620_v46 = vpop.f32.mrb[191].mxu1 }
 0x35b   : > { %v3298_v23 = vld [vmem:[#allocation4 + $0x50] ss:$2 sm:$0xff]  ;;  %v3322_v1 = vld [vmem:[#allocation4 + $0x51] ss:$2 sm:$0xff] }
 0x35c   : > { %v3340_v19 = vmax.f32 %v3298_v23, %v3322_v1  ;;  %3219 = vst.msk [vmem:[#allocation4 + $0x68] sm:$0xff] %vm270_vm0, %v3196_v34  ;;  %v3174_v51 = vadd.f32 %v5790_v16, %v3151_v8  ;;  %v3247_v1 = vld [vmem:[#allocation3 + $0x90] ss:$2 sm:$0xff] }
 0x35d   : > { %v3098_v10 = vpop.f32.mrb[192].mxu1 }
 0x35e   : > { %v3352_v44 = vmax.f32 %v3281_v36, %v3340_v19  ;;  %v3197_v47 = vmax.f32 %v3174_v51, 0.0  ;;  %v3152_v30 = vadd.f32 %v3098_v10, %v5987_v50  ;;  %v4623_v11 = vpop.f32.mrb[193].mxu1  ;;  %v4718_v50 = vld [vmem:[%s6110_s3] ss:$0 sm:$0xff]  ;;  %v3271_v36 = vld [vmem:[#allocation3 + $0x91] ss:$2 sm:$0xff] }
 0x35f   : > { %v3285_v11 = vmax.f32 %v3247_v1, %v3271_v36 }
 0x360   : > { %3364 = vst.msk [vmem:[%s6028_s18 + $0x28] sm:$0xff] %vm270_vm0, %v3352_v44  ;;  %3220 = vst.msk [vmem:[#allocation4 + $0x70] sm:$0xff] %vm270_vm0, %v3197_v47  ;;  %v3175_v40 = vadd.f32 %v5790_v16, %v3152_v30 }
 0x361   : > { %v3103_v33 = vpop.f32.mrb[194].mxu1 }
 0x362   : > { %v3198_v62 = vmax.f32 %v3175_v40, 0.0  ;;  %v3153_v43 = vadd.f32 %v3103_v33, %v5990_v4  ;;  %v4626_v59 = vpop.f32.mrb[195].mxu1  ;;  %v3249_v33 = vld [vmem:[#allocation3 + $0xa0] ss:$2 sm:$0xff] }
 0x363   : > { %v3300_v9 = vld [vmem:[#allocation4 + $0x60] ss:$2 sm:$0xff]  ;;  %v3324_v58 = vld [vmem:[#allocation4 + $0x61] ss:$2 sm:$0xff] }
 0x364   : > { %v3341_v53 = vmax.f32 %v3300_v9, %v3324_v58  ;;  %3221 = vst.msk [vmem:[#allocation4 + $0x78] sm:$0xff] %vm270_vm0, %v3198_v62  ;;  %v3176_v3 = vadd.f32 %v4718_v50, %v3153_v43  ;;  %v3273_v62 = vld [vmem:[#allocation3 + $0xa1] ss:$2 sm:$0xff]  ;;  %v3251_v58 = vld [vmem:[#allocation3 + $0xb0] ss:$2 sm:$0x3] }
 0x365   : > { %v3108_v16 = vpop.f32.mrb[196].mxu1  ;;  %v3286_v59 = vmax.f32 %v3249_v33, %v3273_v62 }
 0x366   : > { %v3353_v63 = vmax.f32 %v3282_v5, %v3341_v53  ;;  %v3199_v24 = vmax.f32 %v3176_v3, 0.0  ;;  %v3154_v21 = vadd.f32 %v3108_v16, %v5993_v32  ;;  %v4629_v18 = vpop.f32.mrb[197].mxu1  ;;  %v3275_v5 = vld [vmem:[#allocation3 + $0xb1] ss:$2 sm:$0x3] }
 0x368   : > { %3365 = vst.msk [vmem:[%s6028_s18 + $0x30] sm:$0xff] %vm270_vm0, %v3353_v63  ;;  %3222 = vst.msk [vmem:[#allocation4 + $0x80] sm:$0xff] %vm270_vm0, %v3199_v24  ;;  %v3177_v4 = vadd.f32 %v4718_v50, %v3154_v21 }
 0x369   : > { %v3113_v48 = vpop.f32.mrb[198].mxu1 }
 0x36a   : > { %v3200_v38 = vmax.f32 %v3177_v4, 0.0  ;;  %v3155_v26 = vadd.f32 %v3113_v48, %v5996_v27  ;;  %v4632_v37 = vpop.f32.mrb[199].mxu1  ;;  %v3245_v27 = vld [vmem:[#allocation3 + $0x80] ss:$2 sm:$0xff] }
 0x36b   : > { %v3302_v14 = vld [vmem:[#allocation4 + $0x70] ss:$2 sm:$0xff]  ;;  %v3326_v61 = vld [vmem:[#allocation4 + $0x71] ss:$2 sm:$0xff]  ;;  %v3284_v6 = vmax.f32 %v3245_v27, %v3269_v17 }
 0x36c   : > { %v3342_v25 = vmax.f32 %v3302_v14, %v3326_v61  ;;  %3223 = vst.msk [vmem:[#allocation4 + $0x88] sm:$0xff] %vm270_vm0, %v3200_v38  ;;  %v3178_v32 = vadd.f32 %v4718_v50, %v3155_v26 }
 0x36d   : > { %v3118_v56 = vpop.f32.mrb[200].mxu1 }
 0x36e   : > { %v3354_v0 = vmax.f32 %v3283_v54, %v3342_v25  ;;  %v3201_v13 = vmax.f32 %v3178_v32, 0.0  ;;  %v3156_v41 = vadd.f32 %v3118_v56, %v5999_v57  ;;  %v4635_v49 = vpop.f32.mrb[201].mxu1 }
 0x370   : > { %3366 = vst.msk [vmem:[%s6028_s18 + $0x38] sm:$0xff] %vm270_vm0, %v3354_v0  ;;  %3224 = vst.msk [vmem:[#allocation4 + $0x90] sm:$0xff] %vm270_vm0, %v3201_v13  ;;  %v3179_v12 = vadd.f32 %v4718_v50, %v3156_v41 }
 0x371   : > { %v3123_v31 = vpop.f32.mrb[202].mxu1 }
 0x372   : > { %v3202_v28 = vmax.f32 %v3179_v12, 0.0  ;;  %v3157_v35 = vadd.f32 %v3123_v31, %v6002_v42  ;;  %v4638_v55 = vpop.f32.mrb[203].mxu1 }
 0x373   : > { %v3304_v22 = vld [vmem:[#allocation4 + $0x80] ss:$2 sm:$0xff]  ;;  %v3328_v20 = vld [vmem:[#allocation4 + $0x81] ss:$2 sm:$0xff] }
 0x374   : > { %v3343_v29 = vmax.f32 %v3304_v22, %v3328_v20  ;;  %3225 = vst.msk [vmem:[#allocation4 + $0x98] sm:$0xff] %vm270_vm0, %v3202_v28  ;;  %v3180_v57 = vadd.f32 %v4718_v50, %v3157_v35 }
 0x375   : > { %v3128_v52 = vpop.f32.mrb[204].mxu1 }
 0x376   : > { %v3355_v34 = vmax.f32 %v3284_v6, %v3343_v29  ;;  %v3203_v8 = vmax.f32 %v3180_v57, 0.0  ;;  %v3158_v46 = vadd.f32 %v3128_v52, %v6005_v2  ;;  %v4641_v23 = vpop.f32.mrb[205].mxu1 }
 0x378   : > { %3367 = vst.msk [vmem:[%s6028_s18 + $0x40] sm:$0xff] %vm270_vm0, %v3355_v34  ;;  %3226 = vst.msk [vmem:[#allocation4 + $0xa0] sm:$0xff] %vm270_vm0, %v3203_v8  ;;  %v3181_v42 = vadd.f32 %v4718_v50, %v3158_v46 }
 0x379   : > { %v3133_v19 = vpop.f32.mrb[206].mxu1 }
 0x37a   : > { %v3204_v51 = vmax.f32 %v3181_v42, 0.0  ;;  %v3159_v10 = vadd.f32 %v3133_v19, %v6008_v15  ;;  %v4644_v44 = vpop.f32.mrb[207].mxu1 }
 0x37b   : > { %v3306_v47 = vld [vmem:[#allocation4 + $0x90] ss:$2 sm:$0xff]  ;;  %v3330_v30 = vld [vmem:[#allocation4 + $0x91] ss:$2 sm:$0xff] }
 0x37c   : > { %v3344_v40 = vmax.f32 %v3306_v47, %v3330_v30  ;;  %3227 = vst.msk [vmem:[#allocation4 + $0xa8] sm:$0xff] %vm270_vm0, %v3204_v51  ;;  %v3182_v2 = vadd.f32 %v4718_v50, %v3159_v10  ;;  %v3287_v50 = vmax.f32 %v3251_v58, %v3275_v5 }
 0x37e   : > { %v3356_v45 = vmax.f32 %v3285_v11, %v3344_v40  ;;  %v3205_v7 = vmax.f32 %v3182_v2, 0.0 }
 0x380   : > { %3368 = vst.msk [vmem:[%s6028_s18 + $0x48] sm:$0xff] %vm270_vm0, %v3356_v45 }
 0x381   : > { %3228 = vst.msk [vmem:[#allocation4 + $0xb0] sm:$0xf] %vm2024_vm2, %v3205_v7 }
 0x383   : > { %v3308_v43 = vld [vmem:[#allocation4 + $0xa0] ss:$2 sm:$0xff]  ;;  %v3332_v15 = vld [vmem:[#allocation4 + $0xa1] ss:$2 sm:$0xff] }
 0x384   : > { %v3345_v9 = vmax.f32 %v3308_v43, %v3332_v15 }
 0x386   : > { %v3357_v53 = vmax.f32 %v3286_v59, %v3345_v9 }
 0x388   : > { %v3310_v3 = vld [vmem:[#allocation4 + $0xb0] ss:$2 sm:$0x3]  ;;  %v3334_v16 = vld [vmem:[#allocation4 + $0xb1] ss:$2 sm:$0x3] }
 0x389   : > { %3369 = vst.msk [vmem:[%s6028_s18 + $0x50] sm:$0xff] %vm270_vm0, %v3357_v53  ;;  %v3346_v63 = vmax.f32 %v3310_v3, %v3334_v16 }
 0x38b   : > { %v3358_v24 = vmax.f32 %v3287_v50, %v3346_v63 }
 0x38d   : > { %3371 = vst.msk [vmem:[%s6028_s18 + $0x58] sm:$0x3] %vm3370_vm3, %v3358_v24 }
 0x38e PF: > { %s14_s15 = sadd.s32 1, %s4725_s15  }
 0x38f   : > { %p11_p4 = scmp.ge.s32.totalorder %s14_s15, 4  }
 0x391   :  { %13 = sbr.rel (!%p11_p4) target bundleno = 1 (0x1), region = 115 }

</bundles_post_ra>
